<compile_context>
chip_gen: v7x
topology: tpu7x:2x2x1
jax: 0.10.0
libtpu: 0.0.40
codegen_flags: <defaults>
</compile_context>

<pallas_src>
import jax
import jax.numpy as jnp
from jax.experimental import pallas as pl
from jax.experimental.pallas import tpu as pltpu

LANE = 128
NEG_BIAS = -1e30  # additive mask / padded-class logit filler


def _round_up(v, m=LANE):
    return ((v + m - 1) // m) * m


def _pad2(a, rows, cols, fill=0.0):
    return jnp.pad(a, ((0, rows - a.shape[0]), (0, cols - a.shape[1])),
                   constant_values=fill)


# ---------------------------------------------------------------------------
# Fully fused kernel: both branches + fc + log_softmax (no grid)
# ---------------------------------------------------------------------------
def fused_fusion_gat_kernel(xs_ref, adjb_ref, wmha_ref, bmha_ref,
                            w1_ref, a1_ref, b1_ref,
                            w2_ref, a2_ref, b2_ref,
                            wxb_ref, wyb_ref, wres_ref, bfc_ref,
                            out_ref):
    def gat(x, adj_bias, w, a_cat, bias):
        # h = x @ W  (PyG lin has no bias)
        h = jnp.dot(x, w, preferred_element_type=jnp.float32)            # [N, Fout_p]
        # one [Fout,2] matmul gives (a_src.h, a_dst.h) per node
        s = jnp.dot(h, a_cat, preferred_element_type=jnp.float32)        # [N, 2]
        a_src = s[:, 0:1]                                                 # per source j
        a_dst = s[:, 1:2]                                                 # per dest   i
        # e_ij = LeakyReLU(a_dst_i + a_src_j); the tiny [N,1]->[1,N] transpose
        # rides the idle XLU slot at N=8.
        # TODO(synk): keep a_src lane-resident in a tiled large-N version.
        e = a_dst + a_src.T                                               # [N_dst, N_src]
        e = jnp.where(e > 0.0, e, 0.2 * e)                                # LeakyReLU 0.2
        e = e + adj_bias                                                  # -1e30 on non-edges
        row_max = jnp.max(e, axis=1, keepdims=True)                       # finite (self-loops)
        p = jnp.exp(e - row_max)                                          # non-edges -> 0
        alpha = p / jnp.sum(p, axis=1, keepdims=True)                     # exact divide
        return jnp.dot(alpha, h, preferred_element_type=jnp.float32) + bias

    def branch(b):
        x = xs_ref[b]                                                     # [N, Fp]
        # seq-len-1 MultiheadAttention == out_proj(v_proj(x)): folded matmul + bias
        xa = jnp.dot(x, wmha_ref[b], preferred_element_type=jnp.float32) + bmha_ref[b]
        h1 = gat(xa, adjb_ref[b], w1_ref[...], a1_ref[...], b1_ref[...])
        h1 = jnp.maximum(h1, 0.0)                                         # ReLU
        # F.dropout (eval mode): identity
        return gat(h1, adjb_ref[b], w2_ref[b], a2_ref[b], b2_ref[b])

    out_x = branch(0)                                                     # [N, Op]
    out_y = branch(1)                                                     # [N, Op]

    # fc on concat([out_x, out_y, x_res]) expressed as three row-slices of W_fc;
    # every dot result is lane-dense because C is padded to 128.
    logits = (jnp.dot(out_x, wxb_ref[...], preferred_element_type=jnp.float32)
              + jnp.dot(out_y, wyb_ref[...], preferred_element_type=jnp.float32)
              + jnp.dot(xs_ref[0], wres_ref[...], preferred_element_type=jnp.float32)
              + bfc_ref[...])                                             # padded classes = -1e30
    m = jnp.max(logits, axis=1, keepdims=True)
    z = logits - m
    lse = jnp.log(jnp.sum(jnp.exp(z), axis=1, keepdims=True))
    out_ref[...] = z - lse


def fusion_gat_forward(params, x, adj_bias_x, y, adj_bias_y):
    n = x.shape[0]
    d = params["dims"]
    x_pad = _pad2(x, n, d["fp"])
    y_pad = _pad2(y, n, d["fp"])
    xs = jnp.stack([x_pad, y_pad])                 # [2, N, Fp]
    adjb = jnp.stack([adj_bias_x, adj_bias_y])     # [2, N, N]

    vspec = pl.BlockSpec(memory_space=pltpu.MemorySpace.VMEM)
    out = pl.pallas_call(
        fused_fusion_gat_kernel,
        out_shape=jax.ShapeDtypeStruct((n, d["cp"]), jnp.float32),
        in_specs=[vspec] * 14,
        out_specs=vspec,
        compiler_params=pltpu.CompilerParams(vmem_limit_bytes=32 * 1024 * 1024),
    )(xs, adjb, *params["weights"])
    return out[:, :d["c"]]                         # drop padded class lanes


# ---------------------------------------------------------------------------
# Parameter construction (deterministic, synthetic) + host-side folding/padding
# ---------------------------------------------------------------------------
def init_params(key, num_node_features, hidden_dim, output_dim, num_classes):
    f, h, o, c = num_node_features, hidden_dim, output_dim, num_classes
    fp, hp, op, cp = (_round_up(v) for v in (f, h, o, c))

    keys = jax.random.split(key, 32)
    ki = iter(range(32))

    def nrm(shape, scale=0.1):
        return (scale * jax.random.normal(keys[next(ki)], shape)).astype(jnp.float32)

    def folded_mha(e):
        # Only Wv/bv/Wo/bo matter for seq_len==1 (softmax over one key == 1).
        # NOTE: synthetic x@W convention; real nn.MultiheadAttention weights
        # would need in_proj slicing + transposes before folding.
        wv, bv = nrm((e, e)), nrm((1, e))
        wo, bo = nrm((e, e)), nrm((1, e))
        return wv @ wo, bv @ wo + bo                           # exact f32 fold

    def gat_params(f_in, f_out, f_in_p, f_out_p):
        w = _pad2(nrm((f_in, f_out)), f_in_p, f_out_p)
        a_cat = _pad2(jnp.concatenate([nrm((f_out, 1)), nrm((f_out, 1))], axis=1),
                      f_out_p, 2)                              # [Fout_p, 2] = (src, dst)
        bias = _pad2(nrm((1, f_out)), 1, f_out_p)
        return w, a_cat, bias

    wm1, bm1 = folded_mha(f)
    wm2, bm2 = folded_mha(f)
    wmha = jnp.stack([_pad2(wm1, fp, fp), _pad2(wm2, fp, fp)])   # [2, Fp, Fp]
    bmha = jnp.stack([_pad2(bm1, 1, fp), _pad2(bm2, 1, fp)])     # [2, 1, Fp]

    w1, a1, b1 = gat_params(f, h, fp, hp)                        # shared gat1
    w2x, a2x, b2x = gat_params(h, o, hp, op)
    w2y, a2y, b2y = gat_params(h, o, hp, op)
    w2 = jnp.stack([w2x, w2y])                                   # [2, Hp, Op]
    a2 = jnp.stack([a2x, a2y])                                   # [2, Op, 2]
    b2 = jnp.stack([b2x, b2y])                                   # [2, 1, Op]

    w_fc = nrm((2 * o + f, c))
    b_fc = nrm((1, c))
    wxb = _pad2(w_fc[:o], op, cp)                                # rows for out_x
    wyb = _pad2(w_fc[o:2 * o], op, cp)                           # rows for out_y
    wres = _pad2(w_fc[2 * o:], fp, cp)                           # rows for x_res
    bfc = _pad2(b_fc, 1, cp, fill=NEG_BIAS)                      # padded classes -> ~-inf

    weights = (wmha, bmha, w1, a1, b1, w2, a2, b2, wxb, wyb, wres, bfc)
    dims = {"f": f, "h": h, "o": o, "c": c, "fp": fp, "hp": hp, "op": op, "cp": cp}
    return {"weights": weights, "dims": dims}


def dense_adj_bias(edge_index, num_nodes):
    """Additive f32 mask: 0 where edge j->i exists (self-loops included, as in
    PyG add_self_loops=True), -1e30 otherwise."""
    adj = jnp.zeros((num_nodes, num_nodes), jnp.bool_)
    adj = adj.at[edge_index[1], edge_index[0]].set(True)
    adj = adj.at[jnp.arange(num_nodes), jnp.arange(num_nodes)].set(True)
    return jnp.where(adj, 0.0, jnp.float32(NEG_BIAS)).astype(jnp.float32)


# ---------------------------------------------------------------------------
# Main
# ---------------------------------------------------------------------------
if __name__ == "__main__":
    num_node_features = 16
    hidden_dim = 32
    output_dim = 16
    num_classes = 4
    n_nodes = 8  # both graphs need the same node count (cat along dim=1)

    key = jax.random.PRNGKey(0)
    k_par, k_x, k_y = jax.random.split(key, 3)

    params = init_params(k_par, num_node_features, hidden_dim, output_dim, num_classes)

    x = jax.random.normal(k_x, (n_nodes, num_node_features), jnp.float32)
    y = jax.random.normal(k_y, (n_nodes, num_node_features), jnp.float32)

    # deterministic small edge lists (src row 0, dst row 1), made bidirectional
    ring_src = jnp.arange(n_nodes)
    ring_dst = (jnp.arange(n_nodes) + 1) % n_nodes
    edge_index_x = jnp.stack([jnp.concatenate([ring_src, ring_dst]),
                              jnp.concatenate([ring_dst, ring_src])])
    hop_dst = (jnp.arange(n_nodes) + 2) % n_nodes
    edge_index_y = jnp.stack([jnp.concatenate([ring_src, hop_dst]),
                              jnp.concatenate([hop_dst, ring_src])])

    adjb_x = dense_adj_bias(edge_index_x, n_nodes)
    adjb_y = dense_adj_bias(edge_index_y, n_nodes)

    out = fusion_gat_forward(params, x, adjb_x, y, adjb_y)
    out = jax.block_until_ready(out)

    assert out.shape == (n_nodes, num_classes)
    assert bool(jnp.all(jnp.isfinite(out)))
    # rows of log_softmax output should exponentiate-sum to 1
    assert bool(jnp.allclose(jnp.sum(jnp.exp(out), axis=1), 1.0, atol=1e-4))

    print("KERNEL_OK")
</pallas_src>

<mosaic_0001>
module attributes {stable_mosaic.version = 11 : i64} {
  func.func @fused_fusion_gat_kernel(%arg0: memref<2x8x128xf32, #tpu.memory_space<vmem>>, %arg1: memref<2x8x8xf32, #tpu.memory_space<vmem>>, %arg2: memref<2x128x128xf32, #tpu.memory_space<vmem>>, %arg3: memref<2x1x128xf32, #tpu.memory_space<vmem>>, %arg4: memref<128x128xf32, #tpu.memory_space<vmem>>, %arg5: memref<128x2xf32, #tpu.memory_space<vmem>>, %arg6: memref<1x128xf32, #tpu.memory_space<vmem>>, %arg7: memref<2x128x128xf32, #tpu.memory_space<vmem>>, %arg8: memref<2x128x2xf32, #tpu.memory_space<vmem>>, %arg9: memref<2x1x128xf32, #tpu.memory_space<vmem>>, %arg10: memref<128x128xf32, #tpu.memory_space<vmem>>, %arg11: memref<128x128xf32, #tpu.memory_space<vmem>>, %arg12: memref<128x128xf32, #tpu.memory_space<vmem>>, %arg13: memref<1x128xf32, #tpu.memory_space<vmem>>, %arg14: memref<8x128xf32, #tpu.memory_space<vmem>>) attributes {dimension_semantics = [], scalar_prefetch = 0 : i64, scratch_operands = 0 : i64, tpu.core_type = #tpu.core_type<tc>} {
    %c0 = arith.constant 0 : index
    %c0_0 = arith.constant 0 : index
    %c0_1 = arith.constant 0 : index
    %0 = vector.load %arg0[%c0, %c0_0, %c0_1] : memref<2x8x128xf32, #tpu.memory_space<vmem>>, vector<1x8x128xf32>
    %1 = vector.shape_cast %0 : vector<1x8x128xf32> to vector<8x128xf32>
    %c0_2 = arith.constant 0 : index
    %c0_3 = arith.constant 0 : index
    %c0_4 = arith.constant 0 : index
    %2 = vector.load %arg2[%c0_2, %c0_3, %c0_4] : memref<2x128x128xf32, #tpu.memory_space<vmem>>, vector<1x128x128xf32>
    %3 = vector.shape_cast %2 : vector<1x128x128xf32> to vector<128x128xf32>
    %cst = arith.constant dense<0.000000e+00> : vector<8x128xf32>
    %4 = tpu.matmul %1, %3, %cst {dimension_numbers = #tpu.dot_dimension_numbers<[1], [0], [0], [1], [0, 0, 1, 1], [], []>} : vector<8x128xf32>, vector<128x128xf32>, vector<8x128xf32> -> vector<8x128xf32>
    %c0_5 = arith.constant 0 : index
    %c0_6 = arith.constant 0 : index
    %c0_7 = arith.constant 0 : index
    %5 = vector.load %arg3[%c0_5, %c0_6, %c0_7] : memref<2x1x128xf32, #tpu.memory_space<vmem>>, vector<1x1x128xf32>
    %6 = vector.shape_cast %5 : vector<1x1x128xf32> to vector<1x128xf32>
    %7 = vector.broadcast %6 : vector<1x128xf32> to vector<8x128xf32>
    %8 = arith.addf %4, %7 : vector<8x128xf32>
    %c0_8 = arith.constant 0 : index
    %c0_9 = arith.constant 0 : index
    %c0_10 = arith.constant 0 : index
    %9 = vector.load %arg1[%c0_8, %c0_9, %c0_10] : memref<2x8x8xf32, #tpu.memory_space<vmem>>, vector<1x8x8xf32>
    %10 = vector.shape_cast %9 : vector<1x8x8xf32> to vector<8x8xf32>
    %c0_11 = arith.constant 0 : index
    %c0_12 = arith.constant 0 : index
    %11 = vector.load %arg4[%c0_11, %c0_12] : memref<128x128xf32, #tpu.memory_space<vmem>>, vector<128x128xf32>
    %c0_13 = arith.constant 0 : index
    %c0_14 = arith.constant 0 : index
    %12 = vector.load %arg5[%c0_13, %c0_14] : memref<128x2xf32, #tpu.memory_space<vmem>>, vector<128x2xf32>
    %c0_15 = arith.constant 0 : index
    %c0_16 = arith.constant 0 : index
    %13 = vector.load %arg6[%c0_15, %c0_16] : memref<1x128xf32, #tpu.memory_space<vmem>>, vector<1x128xf32>
    %cst_17 = arith.constant dense<0.000000e+00> : vector<8x128xf32>
    %14 = tpu.matmul %8, %11, %cst_17 {dimension_numbers = #tpu.dot_dimension_numbers<[1], [0], [0], [1], [0, 0, 1, 1], [], []>} : vector<8x128xf32>, vector<128x128xf32>, vector<8x128xf32> -> vector<8x128xf32>
    %cst_18 = arith.constant dense<0.000000e+00> : vector<8x2xf32>
    %15 = tpu.matmul %14, %12, %cst_18 {dimension_numbers = #tpu.dot_dimension_numbers<[1], [0], [0], [1], [0, 0, 1, 1], [], []>} : vector<8x128xf32>, vector<128x2xf32>, vector<8x2xf32> -> vector<8x2xf32>
    %16 = vector.extract_strided_slice %15 {offsets = [0, 0], sizes = [8, 1], strides = [1, 1]} : vector<8x2xf32> to vector<8x1xf32>
    %17 = vector.extract_strided_slice %15 {offsets = [0, 1], sizes = [8, 1], strides = [1, 1]} : vector<8x2xf32> to vector<8x1xf32>
    %18 = tpu.transpose %16, [1, 0] : vector<8x1xf32> -> vector<1x8xf32>
    %19 = vector.broadcast %17 : vector<8x1xf32> to vector<8x8xf32>
    %20 = vector.broadcast %18 : vector<1x8xf32> to vector<8x8xf32>
    %21 = arith.addf %19, %20 : vector<8x8xf32>
    %cst_19 = arith.constant 0.000000e+00 : f32
    %22 = vector.broadcast %cst_19 : f32 to vector<8x8xf32>
    %23 = arith.cmpf ogt, %21, %22 : vector<8x8xf32>
    %cst_20 = arith.constant 2.000000e-01 : f32
    %24 = vector.broadcast %cst_20 : f32 to vector<8x8xf32>
    %25 = arith.mulf %24, %21 : vector<8x8xf32>
    %26 = arith.select %23, %21, %25 : vector<8x8xi1>, vector<8x8xf32>
    %27 = arith.addf %26, %10 : vector<8x8xf32>
    %cst_21 = arith.constant dense<0xFF800000> : vector<8xf32>
    %28 = vector.multi_reduction <maximumf>, %27, %cst_21 [1] : vector<8x8xf32> to vector<8xf32>
    %29 = vector.shape_cast %28 : vector<8xf32> to vector<8x1xf32>
    %30 = vector.broadcast %29 : vector<8x1xf32> to vector<8x8xf32>
    %31 = arith.subf %27, %30 : vector<8x8xf32>
    %32 = math.exp %31 : vector<8x8xf32>
    %cst_22 = arith.constant dense<0.000000e+00> : vector<8xf32>
    %33 = vector.multi_reduction <add>, %32, %cst_22 [1] : vector<8x8xf32> to vector<8xf32>
    %34 = vector.shape_cast %33 : vector<8xf32> to vector<8x1xf32>
    %35 = vector.broadcast %34 : vector<8x1xf32> to vector<8x8xf32>
    %36 = arith.divf %32, %35 : vector<8x8xf32>
    %cst_23 = arith.constant dense<0.000000e+00> : vector<8x128xf32>
    %37 = tpu.matmul %36, %14, %cst_23 {dimension_numbers = #tpu.dot_dimension_numbers<[1], [0], [0], [1], [0, 0, 1, 1], [], []>} : vector<8x8xf32>, vector<8x128xf32>, vector<8x128xf32> -> vector<8x128xf32>
    %38 = vector.broadcast %13 : vector<1x128xf32> to vector<8x128xf32>
    %39 = arith.addf %37, %38 : vector<8x128xf32>
    %cst_24 = arith.constant 0.000000e+00 : f32
    %40 = vector.broadcast %cst_24 : f32 to vector<8x128xf32>
    %41 = arith.maximumf %39, %40 : vector<8x128xf32>
    %c0_25 = arith.constant 0 : index
    %c0_26 = arith.constant 0 : index
    %c0_27 = arith.constant 0 : index
    %42 = vector.load %arg1[%c0_25, %c0_26, %c0_27] : memref<2x8x8xf32, #tpu.memory_space<vmem>>, vector<1x8x8xf32>
    %43 = vector.shape_cast %42 : vector<1x8x8xf32> to vector<8x8xf32>
    %c0_28 = arith.constant 0 : index
    %c0_29 = arith.constant 0 : index
    %c0_30 = arith.constant 0 : index
    %44 = vector.load %arg7[%c0_28, %c0_29, %c0_30] : memref<2x128x128xf32, #tpu.memory_space<vmem>>, vector<1x128x128xf32>
    %45 = vector.shape_cast %44 : vector<1x128x128xf32> to vector<128x128xf32>
    %c0_31 = arith.constant 0 : index
    %c0_32 = arith.constant 0 : index
    %c0_33 = arith.constant 0 : index
    %46 = vector.load %arg8[%c0_31, %c0_32, %c0_33] : memref<2x128x2xf32, #tpu.memory_space<vmem>>, vector<1x128x2xf32>
    %47 = vector.shape_cast %46 : vector<1x128x2xf32> to vector<128x2xf32>
    %c0_34 = arith.constant 0 : index
    %c0_35 = arith.constant 0 : index
    %c0_36 = arith.constant 0 : index
    %48 = vector.load %arg9[%c0_34, %c0_35, %c0_36] : memref<2x1x128xf32, #tpu.memory_space<vmem>>, vector<1x1x128xf32>
    %49 = vector.shape_cast %48 : vector<1x1x128xf32> to vector<1x128xf32>
    %cst_37 = arith.constant dense<0.000000e+00> : vector<8x128xf32>
    %50 = tpu.matmul %41, %45, %cst_37 {dimension_numbers = #tpu.dot_dimension_numbers<[1], [0], [0], [1], [0, 0, 1, 1], [], []>} : vector<8x128xf32>, vector<128x128xf32>, vector<8x128xf32> -> vector<8x128xf32>
    %cst_38 = arith.constant dense<0.000000e+00> : vector<8x2xf32>
    %51 = tpu.matmul %50, %47, %cst_38 {dimension_numbers = #tpu.dot_dimension_numbers<[1], [0], [0], [1], [0, 0, 1, 1], [], []>} : vector<8x128xf32>, vector<128x2xf32>, vector<8x2xf32> -> vector<8x2xf32>
    %52 = vector.extract_strided_slice %51 {offsets = [0, 0], sizes = [8, 1], strides = [1, 1]} : vector<8x2xf32> to vector<8x1xf32>
    %53 = vector.extract_strided_slice %51 {offsets = [0, 1], sizes = [8, 1], strides = [1, 1]} : vector<8x2xf32> to vector<8x1xf32>
    %54 = tpu.transpose %52, [1, 0] : vector<8x1xf32> -> vector<1x8xf32>
    %55 = vector.broadcast %53 : vector<8x1xf32> to vector<8x8xf32>
    %56 = vector.broadcast %54 : vector<1x8xf32> to vector<8x8xf32>
    %57 = arith.addf %55, %56 : vector<8x8xf32>
    %cst_39 = arith.constant 0.000000e+00 : f32
    %58 = vector.broadcast %cst_39 : f32 to vector<8x8xf32>
    %59 = arith.cmpf ogt, %57, %58 : vector<8x8xf32>
    %cst_40 = arith.constant 2.000000e-01 : f32
    %60 = vector.broadcast %cst_40 : f32 to vector<8x8xf32>
    %61 = arith.mulf %60, %57 : vector<8x8xf32>
    %62 = arith.select %59, %57, %61 : vector<8x8xi1>, vector<8x8xf32>
    %63 = arith.addf %62, %43 : vector<8x8xf32>
    %cst_41 = arith.constant dense<0xFF800000> : vector<8xf32>
    %64 = vector.multi_reduction <maximumf>, %63, %cst_41 [1] : vector<8x8xf32> to vector<8xf32>
    %65 = vector.shape_cast %64 : vector<8xf32> to vector<8x1xf32>
    %66 = vector.broadcast %65 : vector<8x1xf32> to vector<8x8xf32>
    %67 = arith.subf %63, %66 : vector<8x8xf32>
    %68 = math.exp %67 : vector<8x8xf32>
    %cst_42 = arith.constant dense<0.000000e+00> : vector<8xf32>
    %69 = vector.multi_reduction <add>, %68, %cst_42 [1] : vector<8x8xf32> to vector<8xf32>
    %70 = vector.shape_cast %69 : vector<8xf32> to vector<8x1xf32>
    %71 = vector.broadcast %70 : vector<8x1xf32> to vector<8x8xf32>
    %72 = arith.divf %68, %71 : vector<8x8xf32>
    %cst_43 = arith.constant dense<0.000000e+00> : vector<8x128xf32>
    %73 = tpu.matmul %72, %50, %cst_43 {dimension_numbers = #tpu.dot_dimension_numbers<[1], [0], [0], [1], [0, 0, 1, 1], [], []>} : vector<8x8xf32>, vector<8x128xf32>, vector<8x128xf32> -> vector<8x128xf32>
    %74 = vector.broadcast %49 : vector<1x128xf32> to vector<8x128xf32>
    %75 = arith.addf %73, %74 : vector<8x128xf32>
    %c1 = arith.constant 1 : index
    %c0_44 = arith.constant 0 : index
    %c0_45 = arith.constant 0 : index
    %76 = vector.load %arg0[%c1, %c0_44, %c0_45] : memref<2x8x128xf32, #tpu.memory_space<vmem>>, vector<1x8x128xf32>
    %77 = vector.shape_cast %76 : vector<1x8x128xf32> to vector<8x128xf32>
    %c1_46 = arith.constant 1 : index
    %c0_47 = arith.constant 0 : index
    %c0_48 = arith.constant 0 : index
    %78 = vector.load %arg2[%c1_46, %c0_47, %c0_48] : memref<2x128x128xf32, #tpu.memory_space<vmem>>, vector<1x128x128xf32>
    %79 = vector.shape_cast %78 : vector<1x128x128xf32> to vector<128x128xf32>
    %cst_49 = arith.constant dense<0.000000e+00> : vector<8x128xf32>
    %80 = tpu.matmul %77, %79, %cst_49 {dimension_numbers = #tpu.dot_dimension_numbers<[1], [0], [0], [1], [0, 0, 1, 1], [], []>} : vector<8x128xf32>, vector<128x128xf32>, vector<8x128xf32> -> vector<8x128xf32>
    %c1_50 = arith.constant 1 : index
    %c0_51 = arith.constant 0 : index
    %c0_52 = arith.constant 0 : index
    %81 = vector.load %arg3[%c1_50, %c0_51, %c0_52] : memref<2x1x128xf32, #tpu.memory_space<vmem>>, vector<1x1x128xf32>
    %82 = vector.shape_cast %81 : vector<1x1x128xf32> to vector<1x128xf32>
    %83 = vector.broadcast %82 : vector<1x128xf32> to vector<8x128xf32>
    %84 = arith.addf %80, %83 : vector<8x128xf32>
    %c1_53 = arith.constant 1 : index
    %c0_54 = arith.constant 0 : index
    %c0_55 = arith.constant 0 : index
    %85 = vector.load %arg1[%c1_53, %c0_54, %c0_55] : memref<2x8x8xf32, #tpu.memory_space<vmem>>, vector<1x8x8xf32>
    %86 = vector.shape_cast %85 : vector<1x8x8xf32> to vector<8x8xf32>
    %c0_56 = arith.constant 0 : index
    %c0_57 = arith.constant 0 : index
    %87 = vector.load %arg4[%c0_56, %c0_57] : memref<128x128xf32, #tpu.memory_space<vmem>>, vector<128x128xf32>
    %c0_58 = arith.constant 0 : index
    %c0_59 = arith.constant 0 : index
    %88 = vector.load %arg5[%c0_58, %c0_59] : memref<128x2xf32, #tpu.memory_space<vmem>>, vector<128x2xf32>
    %c0_60 = arith.constant 0 : index
    %c0_61 = arith.constant 0 : index
    %89 = vector.load %arg6[%c0_60, %c0_61] : memref<1x128xf32, #tpu.memory_space<vmem>>, vector<1x128xf32>
    %cst_62 = arith.constant dense<0.000000e+00> : vector<8x128xf32>
    %90 = tpu.matmul %84, %87, %cst_62 {dimension_numbers = #tpu.dot_dimension_numbers<[1], [0], [0], [1], [0, 0, 1, 1], [], []>} : vector<8x128xf32>, vector<128x128xf32>, vector<8x128xf32> -> vector<8x128xf32>
    %cst_63 = arith.constant dense<0.000000e+00> : vector<8x2xf32>
    %91 = tpu.matmul %90, %88, %cst_63 {dimension_numbers = #tpu.dot_dimension_numbers<[1], [0], [0], [1], [0, 0, 1, 1], [], []>} : vector<8x128xf32>, vector<128x2xf32>, vector<8x2xf32> -> vector<8x2xf32>
    %92 = vector.extract_strided_slice %91 {offsets = [0, 0], sizes = [8, 1], strides = [1, 1]} : vector<8x2xf32> to vector<8x1xf32>
    %93 = vector.extract_strided_slice %91 {offsets = [0, 1], sizes = [8, 1], strides = [1, 1]} : vector<8x2xf32> to vector<8x1xf32>
    %94 = tpu.transpose %92, [1, 0] : vector<8x1xf32> -> vector<1x8xf32>
    %95 = vector.broadcast %93 : vector<8x1xf32> to vector<8x8xf32>
    %96 = vector.broadcast %94 : vector<1x8xf32> to vector<8x8xf32>
    %97 = arith.addf %95, %96 : vector<8x8xf32>
    %cst_64 = arith.constant 0.000000e+00 : f32
    %98 = vector.broadcast %cst_64 : f32 to vector<8x8xf32>
    %99 = arith.cmpf ogt, %97, %98 : vector<8x8xf32>
    %cst_65 = arith.constant 2.000000e-01 : f32
    %100 = vector.broadcast %cst_65 : f32 to vector<8x8xf32>
    %101 = arith.mulf %100, %97 : vector<8x8xf32>
    %102 = arith.select %99, %97, %101 : vector<8x8xi1>, vector<8x8xf32>
    %103 = arith.addf %102, %86 : vector<8x8xf32>
    %cst_66 = arith.constant dense<0xFF800000> : vector<8xf32>
    %104 = vector.multi_reduction <maximumf>, %103, %cst_66 [1] : vector<8x8xf32> to vector<8xf32>
    %105 = vector.shape_cast %104 : vector<8xf32> to vector<8x1xf32>
    %106 = vector.broadcast %105 : vector<8x1xf32> to vector<8x8xf32>
    %107 = arith.subf %103, %106 : vector<8x8xf32>
    %108 = math.exp %107 : vector<8x8xf32>
    %cst_67 = arith.constant dense<0.000000e+00> : vector<8xf32>
    %109 = vector.multi_reduction <add>, %108, %cst_67 [1] : vector<8x8xf32> to vector<8xf32>
    %110 = vector.shape_cast %109 : vector<8xf32> to vector<8x1xf32>
    %111 = vector.broadcast %110 : vector<8x1xf32> to vector<8x8xf32>
    %112 = arith.divf %108, %111 : vector<8x8xf32>
    %cst_68 = arith.constant dense<0.000000e+00> : vector<8x128xf32>
    %113 = tpu.matmul %112, %90, %cst_68 {dimension_numbers = #tpu.dot_dimension_numbers<[1], [0], [0], [1], [0, 0, 1, 1], [], []>} : vector<8x8xf32>, vector<8x128xf32>, vector<8x128xf32> -> vector<8x128xf32>
    %114 = vector.broadcast %89 : vector<1x128xf32> to vector<8x128xf32>
    %115 = arith.addf %113, %114 : vector<8x128xf32>
    %cst_69 = arith.constant 0.000000e+00 : f32
    %116 = vector.broadcast %cst_69 : f32 to vector<8x128xf32>
    %117 = arith.maximumf %115, %116 : vector<8x128xf32>
    %c1_70 = arith.constant 1 : index
    %c0_71 = arith.constant 0 : index
    %c0_72 = arith.constant 0 : index
    %118 = vector.load %arg1[%c1_70, %c0_71, %c0_72] : memref<2x8x8xf32, #tpu.memory_space<vmem>>, vector<1x8x8xf32>
    %119 = vector.shape_cast %118 : vector<1x8x8xf32> to vector<8x8xf32>
    %c1_73 = arith.constant 1 : index
    %c0_74 = arith.constant 0 : index
    %c0_75 = arith.constant 0 : index
    %120 = vector.load %arg7[%c1_73, %c0_74, %c0_75] : memref<2x128x128xf32, #tpu.memory_space<vmem>>, vector<1x128x128xf32>
    %121 = vector.shape_cast %120 : vector<1x128x128xf32> to vector<128x128xf32>
    %c1_76 = arith.constant 1 : index
    %c0_77 = arith.constant 0 : index
    %c0_78 = arith.constant 0 : index
    %122 = vector.load %arg8[%c1_76, %c0_77, %c0_78] : memref<2x128x2xf32, #tpu.memory_space<vmem>>, vector<1x128x2xf32>
    %123 = vector.shape_cast %122 : vector<1x128x2xf32> to vector<128x2xf32>
    %c1_79 = arith.constant 1 : index
    %c0_80 = arith.constant 0 : index
    %c0_81 = arith.constant 0 : index
    %124 = vector.load %arg9[%c1_79, %c0_80, %c0_81] : memref<2x1x128xf32, #tpu.memory_space<vmem>>, vector<1x1x128xf32>
    %125 = vector.shape_cast %124 : vector<1x1x128xf32> to vector<1x128xf32>
    %cst_82 = arith.constant dense<0.000000e+00> : vector<8x128xf32>
    %126 = tpu.matmul %117, %121, %cst_82 {dimension_numbers = #tpu.dot_dimension_numbers<[1], [0], [0], [1], [0, 0, 1, 1], [], []>} : vector<8x128xf32>, vector<128x128xf32>, vector<8x128xf32> -> vector<8x128xf32>
    %cst_83 = arith.constant dense<0.000000e+00> : vector<8x2xf32>
    %127 = tpu.matmul %126, %123, %cst_83 {dimension_numbers = #tpu.dot_dimension_numbers<[1], [0], [0], [1], [0, 0, 1, 1], [], []>} : vector<8x128xf32>, vector<128x2xf32>, vector<8x2xf32> -> vector<8x2xf32>
    %128 = vector.extract_strided_slice %127 {offsets = [0, 0], sizes = [8, 1], strides = [1, 1]} : vector<8x2xf32> to vector<8x1xf32>
    %129 = vector.extract_strided_slice %127 {offsets = [0, 1], sizes = [8, 1], strides = [1, 1]} : vector<8x2xf32> to vector<8x1xf32>
    %130 = tpu.transpose %128, [1, 0] : vector<8x1xf32> -> vector<1x8xf32>
    %131 = vector.broadcast %129 : vector<8x1xf32> to vector<8x8xf32>
    %132 = vector.broadcast %130 : vector<1x8xf32> to vector<8x8xf32>
    %133 = arith.addf %131, %132 : vector<8x8xf32>
    %cst_84 = arith.constant 0.000000e+00 : f32
    %134 = vector.broadcast %cst_84 : f32 to vector<8x8xf32>
    %135 = arith.cmpf ogt, %133, %134 : vector<8x8xf32>
    %cst_85 = arith.constant 2.000000e-01 : f32
    %136 = vector.broadcast %cst_85 : f32 to vector<8x8xf32>
    %137 = arith.mulf %136, %133 : vector<8x8xf32>
    %138 = arith.select %135, %133, %137 : vector<8x8xi1>, vector<8x8xf32>
    %139 = arith.addf %138, %119 : vector<8x8xf32>
    %cst_86 = arith.constant dense<0xFF800000> : vector<8xf32>
    %140 = vector.multi_reduction <maximumf>, %139, %cst_86 [1] : vector<8x8xf32> to vector<8xf32>
    %141 = vector.shape_cast %140 : vector<8xf32> to vector<8x1xf32>
    %142 = vector.broadcast %141 : vector<8x1xf32> to vector<8x8xf32>
    %143 = arith.subf %139, %142 : vector<8x8xf32>
    %144 = math.exp %143 : vector<8x8xf32>
    %cst_87 = arith.constant dense<0.000000e+00> : vector<8xf32>
    %145 = vector.multi_reduction <add>, %144, %cst_87 [1] : vector<8x8xf32> to vector<8xf32>
    %146 = vector.shape_cast %145 : vector<8xf32> to vector<8x1xf32>
    %147 = vector.broadcast %146 : vector<8x1xf32> to vector<8x8xf32>
    %148 = arith.divf %144, %147 : vector<8x8xf32>
    %cst_88 = arith.constant dense<0.000000e+00> : vector<8x128xf32>
    %149 = tpu.matmul %148, %126, %cst_88 {dimension_numbers = #tpu.dot_dimension_numbers<[1], [0], [0], [1], [0, 0, 1, 1], [], []>} : vector<8x8xf32>, vector<8x128xf32>, vector<8x128xf32> -> vector<8x128xf32>
    %150 = vector.broadcast %125 : vector<1x128xf32> to vector<8x128xf32>
    %151 = arith.addf %149, %150 : vector<8x128xf32>
    %c0_89 = arith.constant 0 : index
    %c0_90 = arith.constant 0 : index
    %152 = vector.load %arg10[%c0_89, %c0_90] : memref<128x128xf32, #tpu.memory_space<vmem>>, vector<128x128xf32>
    %cst_91 = arith.constant dense<0.000000e+00> : vector<8x128xf32>
    %153 = tpu.matmul %75, %152, %cst_91 {dimension_numbers = #tpu.dot_dimension_numbers<[1], [0], [0], [1], [0, 0, 1, 1], [], []>} : vector<8x128xf32>, vector<128x128xf32>, vector<8x128xf32> -> vector<8x128xf32>
    %c0_92 = arith.constant 0 : index
    %c0_93 = arith.constant 0 : index
    %154 = vector.load %arg11[%c0_92, %c0_93] : memref<128x128xf32, #tpu.memory_space<vmem>>, vector<128x128xf32>
    %cst_94 = arith.constant dense<0.000000e+00> : vector<8x128xf32>
    %155 = tpu.matmul %151, %154, %cst_94 {dimension_numbers = #tpu.dot_dimension_numbers<[1], [0], [0], [1], [0, 0, 1, 1], [], []>} : vector<8x128xf32>, vector<128x128xf32>, vector<8x128xf32> -> vector<8x128xf32>
    %156 = arith.addf %153, %155 : vector<8x128xf32>
    %c0_95 = arith.constant 0 : index
    %c0_96 = arith.constant 0 : index
    %c0_97 = arith.constant 0 : index
    %157 = vector.load %arg0[%c0_95, %c0_96, %c0_97] : memref<2x8x128xf32, #tpu.memory_space<vmem>>, vector<1x8x128xf32>
    %158 = vector.shape_cast %157 : vector<1x8x128xf32> to vector<8x128xf32>
    %c0_98 = arith.constant 0 : index
    %c0_99 = arith.constant 0 : index
    %159 = vector.load %arg12[%c0_98, %c0_99] : memref<128x128xf32, #tpu.memory_space<vmem>>, vector<128x128xf32>
    %cst_100 = arith.constant dense<0.000000e+00> : vector<8x128xf32>
    %160 = tpu.matmul %158, %159, %cst_100 {dimension_numbers = #tpu.dot_dimension_numbers<[1], [0], [0], [1], [0, 0, 1, 1], [], []>} : vector<8x128xf32>, vector<128x128xf32>, vector<8x128xf32> -> vector<8x128xf32>
    %161 = arith.addf %156, %160 : vector<8x128xf32>
    %c0_101 = arith.constant 0 : index
    %c0_102 = arith.constant 0 : index
    %162 = vector.load %arg13[%c0_101, %c0_102] : memref<1x128xf32, #tpu.memory_space<vmem>>, vector<1x128xf32>
    %163 = vector.broadcast %162 : vector<1x128xf32> to vector<8x128xf32>
    %164 = arith.addf %161, %163 : vector<8x128xf32>
    %cst_103 = arith.constant dense<0xFF800000> : vector<8xf32>
    %165 = vector.multi_reduction <maximumf>, %164, %cst_103 [1] : vector<8x128xf32> to vector<8xf32>
    %166 = vector.shape_cast %165 : vector<8xf32> to vector<8x1xf32>
    %167 = vector.broadcast %166 : vector<8x1xf32> to vector<8x128xf32>
    %168 = arith.subf %164, %167 : vector<8x128xf32>
    %169 = math.exp %168 : vector<8x128xf32>
    %cst_104 = arith.constant dense<0.000000e+00> : vector<8xf32>
    %170 = vector.multi_reduction <add>, %169, %cst_104 [1] : vector<8x128xf32> to vector<8xf32>
    %171 = vector.shape_cast %170 : vector<8xf32> to vector<8x1xf32>
    %172 = math.log %171 : vector<8x1xf32>
    %173 = vector.broadcast %172 : vector<8x1xf32> to vector<8x128xf32>
    %174 = arith.subf %168, %173 : vector<8x128xf32>
    %c0_105 = arith.constant 0 : index
    %c0_106 = arith.constant 0 : index
    %175 = vector.load %arg14[%c0_105, %c0_106] : memref<8x128xf32, #tpu.memory_space<vmem>>, vector<8x128xf32>
    tpu.vector_store %arg14[%c0_105, %c0_106], %174 {strides = array<i32>} : memref<8x128xf32, #tpu.memory_space<vmem>>, vector<8x128xf32>,
    return
  }
}

</mosaic_0001>

<bundles_post_ra>
// kernel: tpu_custom_call.1
= control target key start
LH: loop header
LB: loop body
LE: loop exit
PB: predicated region body
PF: predicated region fallthrough
CT: control target
= control target key end

     0   :  { %19 = vsyncpa [#allocation3], 0  ;;  %s3839_s0 = inlined_call_operand.hbm [shape: f32[2,8,128], index: 0, kind: input, shape index: {}]   ;;  %s3840_s1 = inlined_call_operand.hbm [shape: f32[2,8,8], index: 1, kind: input, shape index: {}]   ;;  %s3841_s2 = inlined_call_operand.vmem [shape: f32[2,128,128], index: 2, kind: input, shape index: {}]   ;;  %s3842_s3 = inlined_call_operand.vmem [shape: f32[2,1,128], index: 3, kind: input, shape index: {}]   ;;  %s3843_s4 = inlined_call_operand.vmem [shape: f32[128,128], index: 4, kind: input, shape index: {}]   ;;  %s3844_s5 = inlined_call_operand.vmem [shape: f32[128,2], index: 5, kind: input, shape index: {}]   ;;  %s3845_s6 = inlined_call_operand.vmem [shape: f32[1,128], index: 6, kind: input, shape index: {}]   ;;  %s3846_s7 = inlined_call_operand.hbm [shape: f32[2,128,128], index: 7, kind: input, shape index: {}]   ;;  %s3847_s8 = inlined_call_operand.vmem [shape: f32[2,128,2], index: 8, kind: input, shape index: {}]   ;;  %s3848_s9 = inlined_call_operand.vmem [shape: f32[2,1,128], index: 9, kind: input, shape index: {}]   ;;  %s3849_s10 = inlined_call_operand.hbm [shape: f32[128,128], index: 10, kind: input, shape index: {}]   ;;  %s3850_s11 = inlined_call_operand.hbm [shape: f32[128,128], index: 11, kind: input, shape index: {}]   ;;  %s3851_s12 = inlined_call_operand.hbm [shape: f32[128,128], index: 12, kind: input, shape index: {}]   ;;  %s3852_s13 = inlined_call_operand.vmem [shape: f32[1,128], index: 13, kind: input, shape index: {}]   ;;  %s3853_s14 = inlined_call_operand.hbm [shape: f32[8,128], index: 14, kind: output, shape index: {}]  }
   0x1   :  { %20 = vsyncpa [#allocation6], 0 }
   0x2   :  { %21 = vsyncpa [#allocation9], 0 }
   0x3   :  { %22 = vsyncpa [#allocation12], 0 }
   0x4   :  { %23 = vsyncpa [#allocation4], 0  ;;  %s3083_s29 = smov [#allocation5]   ;;  %s3084_s15 = smov [#allocation8]  }
   0x5   :  { %s41_s30 = sshll.u32 %s3083_s29, 4  ;;  %s79_s16 = sshll.u32 %s3084_s15, 4  ;;  %s42_s30 = int_to_ptr.vmem [resolvable:$true] %s41_s30  ;;  %s3171_s16 = int_to_ptr.vmem [resolvable:$true] %s79_s16 }
   0x6   :  { %s2919_s19 = scalar_lea.hbm %s3840_s1, 256 }
   0x7   :  { %p2920_p0 = scmp.ne.s32.totalorder %s3840_s1, %s2919_s19  ;;  %p2923_p1 = scmp.lt.u32.totalorder %s2919_s19, %s3840_s1 }
   0x9   :  { %p2925_p2 = pnand %p2923_p1, %p2920_p0 }
   0xb   :  { %2928 = shalt.err (!%p2925_p2)
}
   0xc   :  { %s2929_s24 = scalar_lea.vmem %s42_s30, 256  ;;  %p2934_p4 = scmp.lt.s32.totalorder %s42_s30, %s42_s30 }
   0xd   :  { %p2930_p3 = scmp.ne.s32.totalorder %s42_s30, %s2929_s24  ;;  %p2935_p5 = scmp.lt.s32.totalorder %s2929_s24, %s2929_s24 }
   0xf   :  { %p2936_p6 = por %p2935_p5, %p2934_p4 }
  0x11   :  { %p2937_p7 = pnand %p2936_p6, %p2930_p3 }
  0x13   :  { %2940 = shalt.err (!%p2937_p7)
}
  0x14   :  { %s3085_s25 = smov 128   ;;  %s3086_s26 = smov 8  }
  0x15   :  { %47 = dma.hbm_to_vmem [thread:$0]  %s3840_s1, 256, %s42_s30, [#allocation6], %s3085_s25, %s3085_s25, %s3086_s26  }
  0x16   :  { %s2941_s17 = scalar_lea.hbm %s3849_s10, 2048 }
  0x17   :  { %p2942_p8 = scmp.ne.s32.totalorder %s3849_s10, %s2941_s17  ;;  %p2945_p9 = scmp.lt.u32.totalorder %s2941_s17, %s3849_s10 }
  0x19   :  { %p2947_p10 = pnand %p2945_p9, %p2942_p8 }
  0x1b   :  { %2950 = shalt.err (!%p2947_p10)
}
  0x1c   :  { %s2951_s22 = scalar_lea.vmem %s3171_s16, 2048  ;;  %p2956_p12 = scmp.lt.s32.totalorder %s3171_s16, %s3171_s16 }
  0x1d   :  { %p2952_p11 = scmp.ne.s32.totalorder %s3171_s16, %s2951_s22  ;;  %p2957_p13 = scmp.lt.s32.totalorder %s2951_s22, %s2951_s22 }
  0x1f   :  { %p2958_p0 = por %p2957_p13, %p2956_p12 }
  0x21   :  { %p2959_p1 = pnand %p2958_p0, %p2952_p11 }
  0x23   :  { %2962 = shalt.err (!%p2959_p1)
}
  0x24   :  { %85 = dma.hbm_to_vmem [thread:$0]  %s3849_s10, 2048, %s3171_s16, [#allocation9], %s3085_s25, %s3085_s25, %s3086_s26  }
  0x25   :  { %s3087_s23 = smov [#allocation2]   ;;  %s3088_s27 = smov [#allocation7]  }
  0x26   :  { %s29_s24 = sshll.u32 %s3087_s23, 4  ;;  %s63_s28 = sshll.u32 %s3088_s27, 4  ;;  %s30_s24 = int_to_ptr.vmem [resolvable:$true] %s29_s24  ;;  %s3208_s28 = int_to_ptr.vmem [resolvable:$true] %s63_s28 }
  0x27   :  { %s2963_s17 = scalar_lea.hbm %s3839_s0, 256 }
  0x28   :  { %p2964_p2 = scmp.ne.s32.totalorder %s3839_s0, %s2963_s17  ;;  %p2967_p3 = scmp.lt.u32.totalorder %s2963_s17, %s3839_s0 }
  0x2a   :  { %p2969_p4 = pnand %p2967_p3, %p2964_p2 }
  0x2c   :  { %2972 = shalt.err (!%p2969_p4)
}
  0x2d   :  { %s2973_s10 = scalar_lea.vmem %s30_s24, 256  ;;  %p2978_p6 = scmp.lt.s32.totalorder %s30_s24, %s30_s24 }
  0x2e   :  { %p2974_p5 = scmp.ne.s32.totalorder %s30_s24, %s2973_s10  ;;  %p2979_p7 = scmp.lt.s32.totalorder %s2973_s10, %s2973_s10 }
  0x30   :  { %p2980_p8 = por %p2979_p7, %p2978_p6 }
  0x32   :  { %p2981_p9 = pnand %p2980_p8, %p2974_p5 }
  0x34   :  { %2984 = shalt.err (!%p2981_p9)
}
  0x35   :  { %35 = dma.hbm_to_vmem [thread:$0]  %s3839_s0, 256, %s30_s24, [#allocation3], %s3085_s25, %s3085_s25, %s3086_s26  }
  0x36   :  { %s2985_s23 = scalar_lea.hbm %s3846_s7, 4096 }
  0x37   :  { %p2986_p10 = scmp.ne.s32.totalorder %s3846_s7, %s2985_s23  ;;  %p2989_p11 = scmp.lt.u32.totalorder %s2985_s23, %s3846_s7 }
  0x39   :  { %p2991_p12 = pnand %p2989_p11, %p2986_p10 }
  0x3b   :  { %2994 = shalt.err (!%p2991_p12)
}
  0x3c   :  { %s2995_s18 = scalar_lea.vmem %s3208_s28, 4096  ;;  %p3000_p0 = scmp.lt.s32.totalorder %s3208_s28, %s3208_s28 }
  0x3d   :  { %p2996_p13 = scmp.ne.s32.totalorder %s3208_s28, %s2995_s18  ;;  %p3001_p1 = scmp.lt.s32.totalorder %s2995_s18, %s2995_s18 }
  0x3f   :  { %p3002_p2 = por %p3001_p1, %p3000_p0 }
  0x41   :  { %p3003_p3 = pnand %p3002_p2, %p2996_p13 }
  0x43   :  { %3006 = shalt.err (!%p3003_p3)
}
  0x44   :  { %69 = dma.hbm_to_vmem [thread:$0]  %s3846_s7, 4096, %s3208_s28, [#allocation6], %s3085_s25, %s3085_s25, %s3086_s26  }
  0x45   :  { %s3089_s19 = smov [#allocation10]   ;;  %s3090_s21 = smov [#allocation11]  }
  0x46   :  { %s91_s20 = sshll.u32 %s3089_s19, 4  ;;  %s103_s10 = sshll.u32 %s3090_s21, 4  ;;  %s92_s20 = int_to_ptr.vmem [resolvable:$true] %s91_s20  ;;  %s3245_s10 = int_to_ptr.vmem [resolvable:$true] %s103_s10 }
  0x47   :  { %s3007_s1 = scalar_lea.hbm %s3850_s11, 2048 }
  0x48   :  { %p3008_p4 = scmp.ne.s32.totalorder %s3850_s11, %s3007_s1  ;;  %p3011_p5 = scmp.lt.u32.totalorder %s3007_s1, %s3850_s11 }
  0x4a   :  { %p3013_p6 = pnand %p3011_p5, %p3008_p4 }
  0x4c   :  { %3016 = shalt.err (!%p3013_p6)
}
  0x4d   :  { %s3017_s7 = scalar_lea.vmem %s92_s20, 2048  ;;  %p3022_p8 = scmp.lt.s32.totalorder %s92_s20, %s92_s20 }
  0x4e   :  { %p3018_p7 = scmp.ne.s32.totalorder %s92_s20, %s3017_s7  ;;  %p3023_p9 = scmp.lt.s32.totalorder %s3017_s7, %s3017_s7 }
  0x50   :  { %p3024_p10 = por %p3023_p9, %p3022_p8 }
  0x52   :  { %p3025_p11 = pnand %p3024_p10, %p3018_p7 }
  0x54   :  { %3028 = shalt.err (!%p3025_p11)
}
  0x55   :  { %97 = dma.hbm_to_vmem [thread:$0]  %s3850_s11, 2048, %s92_s20, [#allocation9], %s3085_s25, %s3085_s25, %s3086_s26  }
  0x56   :  { %s3029_s0 = scalar_lea.hbm %s3851_s12, 2048 }
  0x57   :  { %p3030_p12 = scmp.ne.s32.totalorder %s3851_s12, %s3029_s0  ;;  %p3033_p13 = scmp.lt.u32.totalorder %s3029_s0, %s3851_s12 }
  0x59   :  { %p3035_p0 = pnand %p3033_p13, %p3030_p12 }
  0x5b   :  { %3038 = shalt.err (!%p3035_p0)
}
  0x5c   :  { %s3039_s22 = scalar_lea.vmem %s3245_s10, 2048  ;;  %p3044_p2 = scmp.lt.s32.totalorder %s3245_s10, %s3245_s10 }
  0x5d   :  { %p3040_p1 = scmp.ne.s32.totalorder %s3245_s10, %s3039_s22  ;;  %p3045_p3 = scmp.lt.s32.totalorder %s3039_s22, %s3039_s22 }
  0x5f   :  { %p3046_p4 = por %p3045_p3, %p3044_p2 }
  0x61   :  { %p3047_p5 = pnand %p3046_p4, %p3040_p1 }
  0x63   :  { %3050 = shalt.err (!%p3047_p5)
}
  0x64   :  { %109 = dma.hbm_to_vmem [thread:$0]  %s3851_s12, 2048, %s3245_s10, [#allocation12], %s3085_s25, %s3085_s25, %s3086_s26  }
  0x65   :  { %3073 = dma.done.wait [#allocation3], 256  }
  0x66   :  { %3074 = vsyncadd [#allocation3], 4294967040 }
  0x67   :  { %3075 = dma.done.wait [#allocation6], 4352  }
  0x68   :  { %3076 = vsyncadd [#allocation6], 4294962944 }
  0x69   :  { %3077 = dma.done.wait [#allocation9], 4096  }
  0x6a   :  { %3078 = vsyncadd [#allocation9], 4294963200 }
  0x6b   :  { %3079 = dma.done.wait [#allocation12], 2048  }
  0x6c   :  { %3080 = vsyncadd [#allocation12], 4294965248  ;;  %v3091_v0 = vmov 0.0|0.0   ;;  %vm3092_vm0 = vmmov 0   ;;  %v3093_v1 = vmov 0.0   ;;  %v131_v2 = vld [vmem:[%s3841_s2] sm:$0xff] }
  0x6d   :  { %2571 = vmatprep.subr.bf16.mxu0 %v3091_v0  ;;  %2128 = vmatprep.mubr.msk.f32.mxu0 %vm3092_vm0, %v3093_v1  ;;  %v132_v3 = vld [vmem:[%s3841_s2 + $0x8] sm:$0xff]  ;;  %v133_v4 = vld [vmem:[%s3841_s2 + $0x10] sm:$0xff]  ;;  %v134_v6 = vld [vmem:[%s3841_s2 + $0x18] sm:$0xff]  ;;  %vm444_vm2 = vcmask 64512   ;;  %s3095_s29 = smov [#allocation13]  }
  0x6e   :  { %2595 = vmatprep.subr.bf16.mxu1 %v3091_v0  ;;  %2163 = vmatprep.mubr.msk.f32.mxu1 %vm3092_vm0, %v3093_v1  ;;  %v2572_v5 = vpack.c.bf16 %v132_v3, %v131_v2  ;;  %v2575_v7 = vpack.c.bf16 %v134_v6, %v133_v4  ;;  %v135_v8 = vld [vmem:[%s3841_s2 + $0x20] sm:$0xff]  ;;  %v136_v9 = vld [vmem:[%s3841_s2 + $0x28] sm:$0xff]  ;;  %v227_v12 = vld [vmem:[%s3843_s4 + $0x10] sm:$0xff]  ;;  %s1811_s7 = sshll.u32 %s3095_s29, 4  ;;  %s1812_s7 = int_to_ptr.vmem [resolvable:$true] %s1811_s7 }
  0x6f   :  { %v225_v10 = vld [vmem:[%s3843_s4] sm:$0xff]  ;;  %v226_v11 = vld [vmem:[%s3843_s4 + $0x8] sm:$0xff]  ;;  %v228_v13 = vld [vmem:[%s3843_s4 + $0x18] sm:$0xff]  ;;  %v2578_v14 = vpack.c.bf16 %v136_v9, %v135_v8  ;;  %p3056_p7 = scmp.lt.s32.totalorder %s1812_s7, %s1812_s7 }
  0x70   :  { %2573 = vmatpush3.bf16.msra.mxu0 %v2572_v5  ;;  %v3319_v15 = vpack.c.bf16 %v226_v11, %v225_v10  ;;  %v137_v16 = vld [vmem:[%s3841_s2 + $0x30] sm:$0xff]  ;;  %v138_v17 = vld [vmem:[%s3841_s2 + $0x38] sm:$0xff]  ;;  %v3329_v18 = vpack.c.bf16 %v228_v13, %v227_v12  ;;  %v229_v19 = vld [vmem:[%s3843_s4 + $0x20] sm:$0xff] }
  0x71   :  { %2574 = vmatprep.subr.bf16.mxu0 %v3091_v0  ;;  %v230_v20 = vld [vmem:[%s3843_s4 + $0x28] sm:$0xff]  ;;  %v2581_v21 = vpack.c.bf16 %v138_v17, %v137_v16  ;;  %v139_v22 = vld [vmem:[%s3841_s2 + $0x40] sm:$0xff]  ;;  %v231_v25 = vld [vmem:[%s3843_s4 + $0x30] sm:$0xff] }
  0x72   :  { %2597 = vmatpush3.bf16.msra.mxu1 %v3319_v15  ;;  %v140_v23 = vld [vmem:[%s3841_s2 + $0x48] sm:$0xff]  ;;  %v3346_v24 = vpack.c.bf16 %v230_v20, %v229_v19  ;;  %v232_v26 = vld [vmem:[%s3843_s4 + $0x38] sm:$0xff]  ;;  %v141_v28 = vld [vmem:[%s3841_s2 + $0x50] sm:$0xff]  ;;  %v3094_v19 = vmov 1  }
  0x73   :  { %2598 = vmatprep.subr.bf16.mxu1 %v3091_v0  ;;  %v2584_v27 = vpack.c.bf16 %v140_v23, %v139_v22  ;;  %v142_v29 = vld [vmem:[%s3841_s2 + $0x58] sm:$0xff]  ;;  %v3363_v30 = vpack.c.bf16 %v232_v26, %v231_v25  ;;  %v233_v31 = vld [vmem:[%s3843_s4 + $0x40] sm:$0xff]  ;;  %v234_v32 = vld [vmem:[%s3843_s4 + $0x48] sm:$0xff]  ;;  %2896 = vset.pattern.permute.xlu0 %v3094_v19  ;;  %v435_v25 = vlaneseq }
  0x74   :  { %2576 = vmatpush3.bf16.msra.mxu0 %v2575_v7  ;;  %v2587_v33 = vpack.c.bf16 %v142_v29, %v141_v28  ;;  %v143_v34 = vld [vmem:[%s3841_s2 + $0x60] sm:$0xff]  ;;  %v144_v35 = vld [vmem:[%s3841_s2 + $0x68] sm:$0xff]  ;;  %v3380_v36 = vpack.c.bf16 %v234_v32, %v233_v31  ;;  %v235_v37 = vld [vmem:[%s3843_s4 + $0x50] sm:$0xff]  ;;  %2897 = vset.pattern.permute.xlu1 %v3094_v19 }
  0x75   :  { %2577 = vmatprep.subr.bf16.mxu0 %v3091_v0  ;;  %v236_v38 = vld [vmem:[%s3843_s4 + $0x58] sm:$0xff]  ;;  %v2590_v39 = vpack.c.bf16 %v144_v35, %v143_v34  ;;  %v145_v40 = vld [vmem:[%s3841_s2 + $0x70] sm:$0xff]  ;;  %v237_v43 = vld [vmem:[%s3843_s4 + $0x60] sm:$0xff]  ;;  %v436_v26 = vshrl.u32 %v435_v25, 7 }
  0x76   :  { %2600 = vmatpush3.bf16.msra.mxu1 %v3329_v18  ;;  %v146_v41 = vld [vmem:[%s3841_s2 + $0x78] sm:$0xff]  ;;  %v3397_v42 = vpack.c.bf16 %v236_v38, %v235_v37  ;;  %v238_v44 = vld [vmem:[%s3843_s4 + $0x68] sm:$0xff]  ;;  %v130_v47 = vld [vmem:[#allocation2] sm:$0xff] }
  0x77   :  { %2601 = vmatprep.subr.bf16.mxu1 %v3091_v0  ;;  %v2593_v45 = vpack.c.bf16 %v146_v41, %v145_v40  ;;  %v3408_v46 = vpack.c.bf16 %v238_v44, %v237_v43  ;;  %v239_v48 = vld [vmem:[%s3843_s4 + $0x70] sm:$0xff]  ;;  %v240_v49 = vld [vmem:[%s3843_s4 + $0x78] sm:$0xff]  ;;  %v241_v51 = vld [vmem:[%s3844_s5] sm:$0xff]  ;;  %v3514_v28 = vsub.s32 0, %v436_v26 }
  0x78   :  { %2579 = vmatpush3.bf16.msra.mxu0 %v2578_v14  ;;  %v3422_v50 = vpack.c.bf16 %v240_v49, %v239_v48  ;;  %v242_v52 = vld [vmem:[%s3844_s5 + $0x8] sm:$0xff]  ;;  %v243_v53 = vld [vmem:[%s3844_s5 + $0x10] sm:$0xff]  ;;  %v244_v55 = vld [vmem:[%s3844_s5 + $0x18] sm:$0xff] }
  0x79   :  { %2580 = vmatprep.subr.bf16.mxu0 %v3091_v0  ;;  %v3435_v54 = vpack.c.bf16 %v242_v52, %v241_v51  ;;  %v3441_v56 = vpack.c.bf16 %v244_v55, %v243_v53  ;;  %v245_v57 = vld [vmem:[%s3844_s5 + $0x20] sm:$0xff]  ;;  %v246_v58 = vld [vmem:[%s3844_s5 + $0x28] sm:$0xff]  ;;  %v247_v60 = vld [vmem:[%s3844_s5 + $0x30] sm:$0xff] }
  0x7a   :  { %2603 = vmatpush3.bf16.msra.mxu1 %v3346_v24  ;;  %v3451_v59 = vpack.c.bf16 %v246_v58, %v245_v57  ;;  %v248_v61 = vld [vmem:[%s3844_s5 + $0x38] sm:$0xff]  ;;  %v249_v63 = vld [vmem:[%s3844_s5 + $0x40] sm:$0xff]  ;;  %v250_v2 = vld [vmem:[%s3844_s5 + $0x48] sm:$0xff] }
  0x7b   :  { %2604 = vmatprep.subr.bf16.mxu1 %v3091_v0  ;;  %v3461_v62 = vpack.c.bf16 %v248_v61, %v247_v60  ;;  %v3471_v3 = vpack.c.bf16 %v250_v2, %v249_v63  ;;  %v251_v4 = vld [vmem:[%s3844_s5 + $0x50] sm:$0xff]  ;;  %v252_v5 = vld [vmem:[%s3844_s5 + $0x58] sm:$0xff]  ;;  %v253_v7 = vld [vmem:[%s3844_s5 + $0x60] sm:$0xff] }
  0x7c   :  { %2582 = vmatpush3.bf16.msra.mxu0 %v2581_v21  ;;  %v3481_v6 = vpack.c.bf16 %v252_v5, %v251_v4  ;;  %v254_v8 = vld [vmem:[%s3844_s5 + $0x68] sm:$0xff]  ;;  %v255_v10 = vld [vmem:[%s3844_s5 + $0x70] sm:$0xff]  ;;  %v256_v11 = vld [vmem:[%s3844_s5 + $0x78] sm:$0xff] }
  0x7d   :  { %2583 = vmatprep.subr.bf16.mxu0 %v3091_v0  ;;  %v3491_v9 = vpack.c.bf16 %v254_v8, %v253_v7  ;;  %v3501_v12 = vpack.c.bf16 %v256_v11, %v255_v10  ;;  %v1823_v13 = vld [vmem:[%s3842_s3] ss:$0 sm:$0xff]  ;;  %v3517_v34 = vld [vmem:[#allocation5] sm:$0xff]  ;;  %v537_v48 = vld [vmem:[#allocation7 + $0x8] sm:$0xff] }
  0x7e   :  { %2606 = vmatpush3.bf16.msra.mxu1 %v3363_v30  ;;  %v538_v53 = vld [vmem:[#allocation7 + $0x10] sm:$0xff]  ;;  %v539_v55 = vld [vmem:[#allocation7 + $0x18] sm:$0xff]  ;;  %v540_v58 = vld [vmem:[#allocation7 + $0x20] sm:$0xff] }
  0x7f   :  { %2607 = vmatprep.subr.bf16.mxu1 %v3091_v0  ;;  %v2647_v57 = vpack.c.bf16 %v539_v55, %v538_v53  ;;  %v541_v60 = vld [vmem:[#allocation7 + $0x28] sm:$0xff]  ;;  %v542_v63 = vld [vmem:[#allocation7 + $0x30] sm:$0xff]  ;;  %v543_v2 = vld [vmem:[#allocation7 + $0x38] sm:$0xff] }
  0x80   :  { %2585 = vmatpush3.bf16.msra.mxu0 %v2584_v27  ;;  %v2650_v61 = vpack.c.bf16 %v541_v60, %v540_v58  ;;  %v2653_v4 = vpack.c.bf16 %v543_v2, %v542_v63  ;;  %v544_v5 = vld [vmem:[#allocation7 + $0x40] sm:$0xff]  ;;  %v545_v7 = vld [vmem:[#allocation7 + $0x48] sm:$0xff]  ;;  %v546_v10 = vld [vmem:[#allocation7 + $0x50] sm:$0xff] }
  0x81   :  { %2586 = vmatprep.subr.bf16.mxu0 %v3091_v0  ;;  %v2656_v8 = vpack.c.bf16 %v545_v7, %v544_v5  ;;  %v547_v11 = vld [vmem:[#allocation7 + $0x58] sm:$0xff]  ;;  %v550_v19 = vld [vmem:[#allocation7 + $0x70] sm:$0xff]  ;;  %v3592_v55 = vld [vmem:[%s3845_s6] ss:$0 sm:$0xff] }
  0x82   :  { %2609 = vmatpush3.bf16.msra.mxu1 %v3380_v36  ;;  %v554_v25 = vld [vmem:[%s3847_s8 + $0x10] sm:$0xff] }
  0x83   :  { %2610 = vmatprep.subr.bf16.mxu1 %v3091_v0 }
  0x84   :  { %2588 = vmatpush3.bf16.msra.mxu0 %v2587_v33 }
  0x85   :  { %2589 = vmatprep.subr.bf16.mxu0 %v3091_v0 }
  0x86   :  { %2612 = vmatpush3.bf16.msra.mxu1 %v3397_v42 }
  0x87   :  { %2613 = vmatprep.subr.bf16.mxu1 %v3091_v0 }
  0x88   :  { %2591 = vmatpush3.bf16.msra.mxu0 %v2590_v39 }
  0x89   :  { %2592 = vmatprep.subr.bf16.mxu0 %v3091_v0 }
  0x8a   :  { %2615 = vmatpush3.bf16.msra.mxu1 %v3408_v46 }
  0x8b   :  { %2616 = vmatprep.subr.bf16.mxu1 %v3091_v0 }
  0x8c   :  { %2594 = vmatpush3.bf16.msra.mxu0 %v2593_v45 }
  0x8d   :  { %2619 = vmatprep.subr.bf16.mxu0 %v3091_v0 }
  0x8e   :  { %2618 = vmatpush3.bf16.msra.mxu1 %v3422_v50 }
  0x8f   :  { %2129 = vmatmul.mubr.f32.vlgmr.msra.gmra.mrb[0].mxu0 %v130_v47  ;;  %2201 = vmatprep.subr.mxu1 %v3093_v1  ;;  %v536_v47 = vld [vmem:[#allocation7] sm:$0xff] }
  0x90   :  { %2198 = vmatprep.mubr.msk.f32.mxu0 %vm3092_vm0, %v3093_v1  ;;  %2621 = vmatpush3.bf16.msra.mxu0 %v3435_v54  ;;  %v2644_v51 = vpack.c.bf16 %v537_v48, %v536_v47  ;;  %v564_v47 = vld [vmem:[%s3847_s8 + $0x60] sm:$0xff]  ;;  %v565_v48 = vld [vmem:[%s3847_s8 + $0x68] sm:$0xff] }
  0x91   :  { %2622 = vmatprep.subr.bf16.mxu0 %v3091_v0 }
  0x94   :  { %2624 = vmatpush3.bf16.msra.mxu0 %v3441_v56 }
  0x95   :  { %2625 = vmatprep.subr.bf16.mxu0 %v3091_v0 }
  0x98   :  { %2627 = vmatpush3.bf16.msra.mxu0 %v3451_v59 }
  0x99   :  { %2628 = vmatprep.subr.bf16.mxu0 %v3091_v0 }
  0x9c   :  { %2630 = vmatpush3.bf16.msra.mxu0 %v3461_v62 }
  0x9d   :  { %2631 = vmatprep.subr.bf16.mxu0 %v3091_v0 }
  0xa0   :  { %2633 = vmatpush3.bf16.msra.mxu0 %v3471_v3 }
  0xa1   :  { %2634 = vmatprep.subr.bf16.mxu0 %v3091_v0 }
  0xa4   :  { %2636 = vmatpush3.bf16.msra.mxu0 %v3481_v6 }
  0xa5   :  { %2637 = vmatprep.subr.bf16.mxu0 %v3091_v0 }
  0xa8   :  { %2639 = vmatpush3.bf16.msra.mxu0 %v3491_v9 }
  0xa9   :  { %2640 = vmatprep.subr.bf16.mxu0 %v3091_v0 }
  0xac   :  { %2642 = vmatpush3.bf16.msra.mxu0 %v3501_v12 }
  0xad   :  { %2667 = vmatprep.subr.bf16.mxu0 %v3091_v0 }
 0x162   :  { %v220_v14 = vpop.f32.mrb[0].mxu0 }
 0x163   :  { %v221_v16 = vadd.f32 %v1823_v13, %v220_v14  ;;  %v2130_v17 = vpop.f32.mrb[1].mxu0  ;;  %v2659_v13 = vpack.c.bf16 %v547_v11, %v546_v10  ;;  %v548_v14 = vld [vmem:[#allocation7 + $0x60] sm:$0xff] }
 0x165   :  { %2164 = vmatmul.mubr.f32.vlgmr.msra.gmra.mrb[0].mxu1 %v221_v16  ;;  %v549_v16 = vld [vmem:[#allocation7 + $0x68] sm:$0xff] }
 0x166   :  { %2203 = vmatprep.mubr.msk.f32.mxu1 %vm3092_vm0, %v3093_v1  ;;  %v2662_v17 = vpack.c.bf16 %v549_v16, %v548_v14  ;;  %v1828_v16 = vld [vmem:[%s3841_s2 + $0x80] sm:$0xff] }
 0x238   :  { %v324_v20 = vpop.f32.mrb[0].mxu1 }
 0x239   :  { %v2165_v21 = vpop.f32.mrb[1].mxu1  ;;  %2199 = vmatmul.mubr.f32.vlgmr.msra.gmra.mrb[2].mxu0 %v324_v20  ;;  %2202 = vmatpush3.msra.mxu1 %v324_v20  ;;  %v551_v20 = vld [vmem:[#allocation7 + $0x78] sm:$0xff] }
 0x23a   :  { %2643 = vmatprep.subr.bf16.mxu1 %v3091_v0  ;;  %2273 = vmatprep.mubr.msk.f32.mxu0 %vm3092_vm0, %v3093_v1  ;;  %v2665_v21 = vpack.c.bf16 %v551_v20, %v550_v19 }
 0x30c   :  { %v394_v22 = vpop.f32.mrb[2].mxu0 }
 0x30d   :  { %432 = vperm.xlu0 %2896, %v394_v22   ;;  %v2200_v23 = vpop.f32.mrb[3].mxu0 }
 0x30e   :  { %v553_v23 = vld [vmem:[%s3847_s8 + $0x8] sm:$0xff] }
 0x32b   :  { %398 = vxpose.xlu0.b32.start.end [1/1] (short) (narrow) %v394_v22, 8  ;;  %v552_v22 = vld [vmem:[%s3847_s8] sm:$0xff] }
 0x32c   :  { %v2668_v26 = vpack.c.bf16 %v553_v23, %v552_v22  ;;  %v1831_v22 = vld [vmem:[%s3841_s2 + $0x98] sm:$0xff] }
 0x32e   :  { %2669 = vmatpush3.bf16.msra.mxu0 %v2668_v26  ;;  %v1833_v26 = vld [vmem:[%s3841_s2 + $0xa8] sm:$0xff] }
 0x32f   :  { %2670 = vmatprep.subr.bf16.mxu0 %v3091_v0 }
 0x38c   :  { %v433_v27 = vpop.permute.xlu0 %432 }
 0x3ab   :  { %v414_v29 = vpop.trf.xlu0 }
 0x3ac   :  { %v438_v31 = vrot.slane %v414_v29, %v3514_v28 }
 0x3ae   :  { %v439_v32 = vadd.f32 %v438_v31, %v433_v27  ;;  %v555_v27 = vld [vmem:[%s3847_s8 + $0x18] sm:$0xff]  ;;  %v556_v31 = vld [vmem:[%s3847_s8 + $0x20] sm:$0xff] }
 0x3af   :  { %v2671_v29 = vpack.c.bf16 %v555_v27, %v554_v25  ;;  %v1832_v25 = vld [vmem:[%s3841_s2 + $0xa0] sm:$0xff] }
 0x3b0   :  { %v441_v33 = vmul.f32 0.2, %v439_v32  ;;  %vm440_vm1 = vcmp.gt.f32.partialorder %v439_v32, 0.0  ;;  %v2698_v27 = vpack.c.bf16 %v1833_v26, %v1832_v25  ;;  %v1228_v26 = vld [vmem:[#allocation7 + $0xe0] sm:$0xff] }
 0x3b1   :  { %2672 = vmatpush3.bf16.msra.mxu0 %v2671_v29  ;;  %v1834_v29 = vld [vmem:[%s3841_s2 + $0xb0] sm:$0xff] }
 0x3b2   :  { %v442_v35 = vsel %vm440_vm1, %v439_v32, %v441_v33  ;;  %v557_v32 = vld [vmem:[%s3847_s8 + $0x28] sm:$0xff]  ;;  %2673 = vmatprep.subr.bf16.mxu0 %v3091_v0 }
 0x3b3   :  { %v443_v37 = vadd.f32 %v442_v35, %v3517_v34  ;;  %v2674_v33 = vpack.c.bf16 %v557_v32, %v556_v31  ;;  %v558_v35 = vld [vmem:[%s3847_s8 + $0x30] sm:$0xff]  ;;  %v1835_v31 = vld [vmem:[%s3841_s2 + $0xb8] sm:$0xff] }
 0x3b4   :  { %v2701_v32 = vpack.c.bf16 %v1835_v31, %v1834_v29 }
 0x3b5   :  { %v445_v38 = vsel %vm444_vm2, %v443_v37, -inf  ;;  %2675 = vmatpush3.bf16.msra.mxu0 %v2674_v33  ;;  %v1836_v33 = vld [vmem:[%s3841_s2 + $0xc0] sm:$0xff] }
 0x3b6   :  { %446 = vmax.xlane.f32.xlu1 %v445_v38  ;;  %2676 = vmatprep.subr.bf16.mxu0 %v3091_v0 }
 0x443   :  { %v447_v39 = vpop.xlane.xlu1 %446 }
 0x444   :  { %v448_v40 = vsub.f32 %v443_v37, %v447_v39  ;;  %v559_v37 = vld [vmem:[%s3847_s8 + $0x38] sm:$0xff]  ;;  %v560_v39 = vld [vmem:[%s3847_s8 + $0x40] sm:$0xff] }
 0x445   :  { %v2677_v38 = vpack.c.bf16 %v559_v37, %v558_v35  ;;  %v1837_v35 = vld [vmem:[%s3841_s2 + $0xc8] sm:$0xff] }
 0x446   :  { %v449_v41 = vmul.f32 1.442695, %v448_v40  ;;  %v561_v40 = vld [vmem:[%s3847_s8 + $0x48] sm:$0xff]  ;;  %v2704_v37 = vpack.c.bf16 %v1837_v35, %v1836_v33  ;;  %v1230_v35 = vld [vmem:[#allocation7 + $0xf0] sm:$0xff] }
 0x447   :  { %2678 = vmatpush3.bf16.msra.mxu0 %v2677_v38  ;;  %v1838_v38 = vld [vmem:[%s3841_s2 + $0xd0] sm:$0xff] }
 0x448   :  { %2898 = vpow2.f32 %v449_v41  ;;  %v2680_v41 = vpack.c.bf16 %v561_v40, %v560_v39  ;;  %2679 = vmatprep.subr.bf16.mxu0 %v3091_v0  ;;  %v1839_v39 = vld [vmem:[%s3841_s2 + $0xd8] sm:$0xff] }
 0x449   :  { %v2707_v40 = vpack.c.bf16 %v1839_v39, %v1838_v38  ;;  %v1847_v39 = vld [vmem:[%s3847_s8 + $0x80] sm:$0xff] }
 0x44b   :  { %2681 = vmatpush3.bf16.msra.mxu0 %v2680_v41  ;;  %v1840_v41 = vld [vmem:[%s3841_s2 + $0xe0] sm:$0xff] }
 0x44c   :  { %2682 = vmatprep.subr.bf16.mxu0 %v3091_v0 }
 0x452   :  { %v2899_v43 = vpop.eup %2898 }
 0x453   :  { %v451_v44 = vsel %vm444_vm2, %v2899_v43, 0.0 }
 0x454   :  { %452 = vadd.xlane.f32.xlu1 %v451_v44  ;;  %v563_v44 = vld [vmem:[%s3847_s8 + $0x58] sm:$0xff] }
 0x4e1   :  { %v453_v45 = vpop.xlane.xlu1 %452 }
 0x4e2   :  { %2900 = vrcp.f32 %v453_v45 }
 0x4ec   :  { %v2901_v49 = vpop.eup %2900 }
 0x4ed   :  { %v455_v52 = vmul.f32 %v2901_v49, %v2899_v43  ;;  %v562_v43 = vld [vmem:[%s3847_s8 + $0x50] sm:$0xff]  ;;  %v2686_v49 = vpack.c.bf16 %v565_v48, %v564_v47  ;;  %v1843_v47 = vld [vmem:[%s3841_s2 + $0xf8] sm:$0xff] }
 0x4ee   :  { %v2683_v45 = vpack.c.bf16 %v563_v44, %v562_v43  ;;  %v1841_v43 = vld [vmem:[%s3841_s2 + $0xe8] sm:$0xff] }
 0x4ef   :  { %2204 = vmatmul.mubr.msk.f32.vlgmr.msra.gmra.mrb[2].mxu1 %vm444_vm2, %v455_v52  ;;  %v567_v52 = vld [vmem:[%s3847_s8 + $0x78] sm:$0xff]  ;;  %v2710_v44 = vpack.c.bf16 %v1841_v43, %v1840_v41  ;;  %v1849_v41 = vld [vmem:[%s3847_s8 + $0x90] sm:$0xff] }
 0x4f0   :  { %2645 = vmatpush3.bf16.msra.mxu1 %v2644_v51  ;;  %2238 = vmatprep.mubr.msk.f32.mxu1 %vm3092_vm0, %v3093_v1  ;;  %v566_v51 = vld [vmem:[%s3847_s8 + $0x70] sm:$0xff] }
 0x4f1   :  { %2646 = vmatprep.subr.bf16.mxu1 %v3091_v0  ;;  %2684 = vmatpush3.bf16.msra.mxu0 %v2683_v45  ;;  %v2689_v53 = vpack.c.bf16 %v567_v52, %v566_v51  ;;  %v1842_v45 = vld [vmem:[%s3841_s2 + $0xf0] sm:$0xff] }
 0x4f2   :  { %2685 = vmatprep.subr.bf16.mxu0 %v3091_v0  ;;  %v2713_v48 = vpack.c.bf16 %v1843_v47, %v1842_v45  ;;  %v1851_v47 = vld [vmem:[%s3847_s8 + $0xa0] sm:$0xff] }
 0x4f4   :  { %2648 = vmatpush3.bf16.msra.mxu1 %v2647_v57 }
 0x4f5   :  { %2649 = vmatprep.subr.bf16.mxu1 %v3091_v0  ;;  %2687 = vmatpush3.bf16.msra.mxu0 %v2686_v49  ;;  %v846_v49 = vld [vmem:[#allocation2 + $0x8] sm:$0xff] }
 0x4f6   :  { %2688 = vmatprep.subr.bf16.mxu0 %v3091_v0 }
 0x4f8   :  { %2651 = vmatpush3.bf16.msra.mxu1 %v2650_v61 }
 0x4f9   :  { %2652 = vmatprep.subr.bf16.mxu1 %v3091_v0  ;;  %2690 = vmatpush3.bf16.msra.mxu0 %v2689_v53 }
 0x4fa   :  { %2715 = vmatprep.subr.bf16.mxu0 %v3091_v0 }
 0x4fc   :  { %2654 = vmatpush3.bf16.msra.mxu1 %v2653_v4 }
 0x4fd   :  { %2655 = vmatprep.subr.bf16.mxu1 %v3091_v0 }
 0x500   :  { %2657 = vmatpush3.bf16.msra.mxu1 %v2656_v8 }
 0x501   :  { %2658 = vmatprep.subr.bf16.mxu1 %v3091_v0 }
 0x504   :  { %2660 = vmatpush3.bf16.msra.mxu1 %v2659_v13 }
 0x505   :  { %2661 = vmatprep.subr.bf16.mxu1 %v3091_v0 }
 0x508   :  { %2663 = vmatpush3.bf16.msra.mxu1 %v2662_v17 }
 0x509   :  { %2664 = vmatprep.subr.bf16.mxu1 %v3091_v0 }
 0x50c   :  { %2666 = vmatpush3.bf16.msra.mxu1 %v2665_v21  ;;  %v1830_v21 = vld [vmem:[%s3841_s2 + $0x90] sm:$0xff] }
 0x50d   :  { %2276 = vmatprep.subr.mxu1 %v3093_v1  ;;  %v2695_v23 = vpack.c.bf16 %v1831_v22, %v1830_v21  ;;  %v1226_v22 = vld [vmem:[#allocation7 + $0xd0] sm:$0xff] }
 0x5c2   :  { %v531_v57 = vpop.f32.mrb[2].mxu1 }
 0x5c3   :  { %v532_v58 = vadd.f32 %v3592_v55, %v531_v57  ;;  %v2205_v60 = vpop.f32.mrb[3].mxu1 }
 0x5c5   :  { %v535_v61 = vmax.f32 %v532_v58, 0.0 }
 0x5c7   :  { %2239 = vmatmul.mubr.f32.vlgmr.msra.gmra.mrb[4].mxu1 %v535_v61 }
 0x5c8   :  { %2278 = vmatprep.mubr.msk.f32.mxu1 %vm3092_vm0, %v3093_v1 }
 0x69a   :  { %v635_v63 = vpop.f32.mrb[4].mxu1 }
 0x69b   :  { %v2240_v2 = vpop.f32.mrb[5].mxu1  ;;  %2274 = vmatmul.mubr.f32.vlgmr.msra.gmra.mrb[4].mxu0 %v635_v63  ;;  %2277 = vmatpush3.msra.mxu1 %v635_v63  ;;  %v3708_v63 = vld [vmem:[#allocation5 + $0x8] sm:$0xff] }
 0x69c   :  { %2691 = vmatprep.subr.bf16.mxu1 %v3091_v0  ;;  %2717 = vmatpush3.bf16.msra.mxu0 %v3319_v15 }
 0x69d   :  { %2718 = vmatprep.subr.bf16.mxu0 %v3091_v0  ;;  %2348 = vmatprep.mubr.msk.f32.mxu0 %vm3092_vm0, %v3093_v1 }
 0x6a0   :  { %2720 = vmatpush3.bf16.msra.mxu0 %v3329_v18 }
 0x6a1   :  { %2721 = vmatprep.subr.bf16.mxu0 %v3091_v0 }
 0x6a4   :  { %2723 = vmatpush3.bf16.msra.mxu0 %v3346_v24 }
 0x6a5   :  { %2724 = vmatprep.subr.bf16.mxu0 %v3091_v0 }
 0x6a8   :  { %2726 = vmatpush3.bf16.msra.mxu0 %v3363_v30 }
 0x6a9   :  { %2727 = vmatprep.subr.bf16.mxu0 %v3091_v0 }
 0x6ac   :  { %2729 = vmatpush3.bf16.msra.mxu0 %v3380_v36 }
 0x6ad   :  { %2730 = vmatprep.subr.bf16.mxu0 %v3091_v0 }
 0x6b0   :  { %2732 = vmatpush3.bf16.msra.mxu0 %v3397_v42 }
 0x6b1   :  { %2733 = vmatprep.subr.bf16.mxu0 %v3091_v0 }
 0x6b4   :  { %2735 = vmatpush3.bf16.msra.mxu0 %v3408_v46 }
 0x6b5   :  { %2736 = vmatprep.subr.bf16.mxu0 %v3091_v0 }
 0x6b8   :  { %2738 = vmatpush3.bf16.msra.mxu0 %v3422_v50 }
 0x6b9   :  { %2763 = vmatprep.subr.bf16.mxu0 %v3091_v0 }
 0x76e   :  { %v705_v15 = vpop.f32.mrb[4].mxu0 }
 0x76f   :  { %743 = vperm.xlu1 %2897, %v705_v15   ;;  %v2275_v18 = vpop.f32.mrb[5].mxu0 }
 0x798   :  { %709 = vxpose.xlu1.b32.start.end [1/1] (short) (narrow) %v705_v15, 8 }
 0x7ee   :  { %v744_v24 = vpop.permute.xlu1 %743 }
 0x818   :  { %v725_v30 = vpop.trf.xlu1 }
 0x819   :  { %v749_v36 = vrot.slane %v725_v30, %v3514_v28 }
 0x81b   :  { %v750_v4 = vadd.f32 %v749_v36, %v744_v24 }
 0x81d   :  { %v752_v42 = vmul.f32 0.2, %v750_v4  ;;  %vm751_vm3 = vcmp.gt.f32.partialorder %v750_v4, 0.0 }
 0x81f   :  { %v753_v5 = vsel %vm751_vm3, %v750_v4, %v752_v42 }
 0x820   :  { %v754_v46 = vadd.f32 %v753_v5, %v3517_v34  ;;  %v1829_v34 = vld [vmem:[%s3841_s2 + $0x88] sm:$0xff]  ;;  %v1216_v5 = vld [vmem:[#allocation7 + $0x80] sm:$0xff] }
 0x821   :  { %v2692_v19 = vpack.c.bf16 %v1829_v34, %v1828_v16  ;;  %v1222_v16 = vld [vmem:[#allocation7 + $0xb0] sm:$0xff]  ;;  %v1223_v34 = vld [vmem:[#allocation7 + $0xb8] sm:$0xff] }
 0x822   :  { %v755_v7 = vsel %vm444_vm2, %v754_v46, -inf }
 0x823   :  { %756 = vmax.xlane.f32.xlu0 %v755_v7  ;;  %v1218_v7 = vld [vmem:[#allocation7 + $0x90] sm:$0xff] }
 0x8b0   :  { %v757_v50 = vpop.xlane.xlu0 %756 }
 0x8b1   :  { %v758_v8 = vsub.f32 %v754_v46, %v757_v50  ;;  %v1217_v46 = vld [vmem:[#allocation7 + $0x88] sm:$0xff] }
 0x8b2   :  { %v2764_v50 = vpack.c.bf16 %v1217_v46, %v1216_v5 }
 0x8b3   :  { %v759_v10 = vmul.f32 1.442695, %v758_v8  ;;  %v1219_v8 = vld [vmem:[#allocation7 + $0x98] sm:$0xff] }
 0x8b5   :  { %2902 = vpow2.f32 %v759_v10  ;;  %v2767_v10 = vpack.c.bf16 %v1219_v8, %v1218_v7 }
 0x8bf   :  { %v2903_v11 = vpop.eup %2902 }
 0x8c0   :  { %v761_v13 = vsel %vm444_vm2, %v2903_v11, 0.0 }
 0x8c1   :  { %762 = vadd.xlane.f32.xlu1 %v761_v13  ;;  %v1221_v13 = vld [vmem:[#allocation7 + $0xa8] sm:$0xff] }
 0x94e   :  { %v763_v14 = vpop.xlane.xlu1 %762 }
 0x94f   :  { %2904 = vrcp.f32 %v763_v14 }
 0x959   :  { %v2905_v17 = vpop.eup %2904 }
 0x95a   :  { %v765_v20 = vmul.f32 %v2905_v17, %v2903_v11  ;;  %v1220_v11 = vld [vmem:[#allocation7 + $0xa0] sm:$0xff]  ;;  %v2773_v17 = vpack.c.bf16 %v1223_v34, %v1222_v16 }
 0x95b   :  { %v2770_v14 = vpack.c.bf16 %v1221_v13, %v1220_v11 }
 0x95c   :  { %2279 = vmatmul.mubr.msk.f32.vlgmr.msra.gmra.mrb[6].mxu1 %vm444_vm2, %v765_v20  ;;  %v1225_v20 = vld [vmem:[#allocation7 + $0xc8] sm:$0xff] }
 0x95d   :  { %2693 = vmatpush3.bf16.msra.mxu1 %v2692_v19  ;;  %2313 = vmatprep.mubr.msk.f32.mxu1 %vm3092_vm0, %v3093_v1  ;;  %v1224_v19 = vld [vmem:[#allocation7 + $0xc0] sm:$0xff] }
 0x95e   :  { %2694 = vmatprep.subr.bf16.mxu1 %v3091_v0  ;;  %v2776_v21 = vpack.c.bf16 %v1225_v20, %v1224_v19  ;;  %v1543_v20 = vld [vmem:[#allocation10] sm:$0xff] }
 0x961   :  { %2696 = vmatpush3.bf16.msra.mxu1 %v2695_v23  ;;  %v1227_v23 = vld [vmem:[#allocation7 + $0xd8] sm:$0xff] }
 0x962   :  { %2697 = vmatprep.subr.bf16.mxu1 %v3091_v0  ;;  %v2779_v25 = vpack.c.bf16 %v1227_v23, %v1226_v22  ;;  %v1546_v23 = vld [vmem:[#allocation10 + $0x18] sm:$0xff] }
 0x965   :  { %2699 = vmatpush3.bf16.msra.mxu1 %v2698_v27  ;;  %v1229_v27 = vld [vmem:[#allocation7 + $0xe8] sm:$0xff] }
 0x966   :  { %2700 = vmatprep.subr.bf16.mxu1 %v3091_v0  ;;  %v2782_v29 = vpack.c.bf16 %v1229_v27, %v1228_v26  ;;  %v1548_v26 = vld [vmem:[#allocation10 + $0x28] sm:$0xff] }
 0x969   :  { %2702 = vmatpush3.bf16.msra.mxu1 %v2701_v32 }
 0x96a   :  { %2703 = vmatprep.subr.bf16.mxu1 %v3091_v0 }
 0x96d   :  { %2705 = vmatpush3.bf16.msra.mxu1 %v2704_v37  ;;  %v1231_v37 = vld [vmem:[#allocation7 + $0xf8] sm:$0xff] }
 0x96e   :  { %2706 = vmatprep.subr.bf16.mxu1 %v3091_v0  ;;  %v2785_v38 = vpack.c.bf16 %v1231_v37, %v1230_v35  ;;  %v1552_v35 = vld [vmem:[#allocation10 + $0x48] sm:$0xff] }
 0x971   :  { %2708 = vmatpush3.bf16.msra.mxu1 %v2707_v40  ;;  %v1848_v40 = vld [vmem:[%s3847_s8 + $0x88] sm:$0xff] }
 0x972   :  { %2709 = vmatprep.subr.bf16.mxu1 %v3091_v0  ;;  %v2788_v43 = vpack.c.bf16 %v1848_v40, %v1847_v39  ;;  %v1554_v39 = vld [vmem:[#allocation10 + $0x58] sm:$0xff] }
 0x975   :  { %2711 = vmatpush3.bf16.msra.mxu1 %v2710_v44  ;;  %v1850_v44 = vld [vmem:[%s3847_s8 + $0x98] sm:$0xff] }
 0x976   :  { %2712 = vmatprep.subr.bf16.mxu1 %v3091_v0  ;;  %v2791_v45 = vpack.c.bf16 %v1850_v44, %v1849_v41  ;;  %v1555_v41 = vld [vmem:[#allocation10 + $0x60] sm:$0xff] }
 0x979   :  { %2714 = vmatpush3.bf16.msra.mxu1 %v2713_v48  ;;  %v1852_v48 = vld [vmem:[%s3847_s8 + $0xa8] sm:$0xff] }
 0x97a   :  { %2739 = vmatprep.subr.bf16.mxu1 %v3091_v0 }
 0x97c   :  { %2314 = vmatmul.mubr.f32.vlgmr.msra.gmra.mrb[8].mxu1 %v846_v49  ;;  %v2794_v49 = vpack.c.bf16 %v1852_v48, %v1851_v47  ;;  %v1558_v47 = vld [vmem:[#allocation10 + $0x78] sm:$0xff] }
 0x97d   :  { %2741 = vmatpush3.bf16.msra.mxu1 %v3435_v54  ;;  %2383 = vmatprep.mubr.msk.f32.mxu1 %vm3092_vm0, %v3093_v1 }
 0x97e   :  { %2742 = vmatprep.subr.bf16.mxu1 %v3091_v0 }
 0x981   :  { %2744 = vmatpush3.bf16.msra.mxu1 %v3441_v56 }
 0x982   :  { %2745 = vmatprep.subr.bf16.mxu1 %v3091_v0 }
 0x985   :  { %2747 = vmatpush3.bf16.msra.mxu1 %v3451_v59  ;;  %v1845_v59 = vld [vmem:[%s3842_s3 + $0x1] ss:$0 sm:$0xff] }
 0x986   :  { %2748 = vmatprep.subr.bf16.mxu1 %v3091_v0 }
 0x989   :  { %2750 = vmatpush3.bf16.msra.mxu1 %v3461_v62 }
 0x98a   :  { %2751 = vmatprep.subr.bf16.mxu1 %v3091_v0 }
 0x98d   :  { %2753 = vmatpush3.bf16.msra.mxu1 %v3471_v3 }
 0x98e   :  { %2754 = vmatprep.subr.bf16.mxu1 %v3091_v0 }
 0x991   :  { %2756 = vmatpush3.bf16.msra.mxu1 %v3481_v6 }
 0x992   :  { %2757 = vmatprep.subr.bf16.mxu1 %v3091_v0 }
 0x995   :  { %2759 = vmatpush3.bf16.msra.mxu1 %v3491_v9 }
 0x996   :  { %2760 = vmatprep.subr.bf16.mxu1 %v3091_v0 }
 0x999   :  { %2762 = vmatpush3.bf16.msra.mxu1 %v3501_v12 }
 0x99a   :  { %2386 = vmatprep.subr.mxu1 %v3093_v1 }
 0xa2f   :  { %v3697_v54 = vpop.f32.mrb[6].mxu1 }
 0xa30   :  { %v2280_v56 = vpop.f32.mrb[7].mxu1 }
 0xa31   :  { %v1853_v56 = vld [vmem:[%s3847_s8 + $0xb0] sm:$0xff] }
 0xa4f   :  { %v938_v62 = vpop.f32.mrb[8].mxu1 }
 0xa50   :  { %v939_v3 = vadd.f32 %v1845_v59, %v938_v62  ;;  %v2315_v6 = vpop.f32.mrb[9].mxu1  ;;  %v1854_v59 = vld [vmem:[%s3847_s8 + $0xb8] sm:$0xff] }
 0xa51   :  { %v2797_v62 = vpack.c.bf16 %v1854_v59, %v1853_v56  ;;  %v1856_v6 = vld [vmem:[%s3847_s8 + $0xc8] sm:$0xff]  ;;  %v1527_v56 = vld [vmem:[#allocation8] sm:$0xff] }
 0xa52   :  { %2349 = vmatmul.mubr.f32.vlgmr.msra.gmra.mrb[6].mxu0 %v939_v3  ;;  %v1855_v3 = vld [vmem:[%s3847_s8 + $0xc0] sm:$0xff]  ;;  %v1528_v59 = vld [vmem:[#allocation8 + $0x8] sm:$0xff] }
 0xa53   :  { %2423 = vmatprep.mubr.msk.f32.mxu0 %vm3092_vm0, %v3093_v1  ;;  %2765 = vmatpush3.bf16.msra.mxu0 %v2764_v50 }
 0xa54   :  { %2766 = vmatprep.subr.bf16.mxu0 %v3091_v0 }
 0xa57   :  { %2768 = vmatpush3.bf16.msra.mxu0 %v2767_v10 }
 0xa58   :  { %2769 = vmatprep.subr.bf16.mxu0 %v3091_v0 }
 0xa5b   :  { %2771 = vmatpush3.bf16.msra.mxu0 %v2770_v14 }
 0xa5c   :  { %2772 = vmatprep.subr.bf16.mxu0 %v3091_v0 }
 0xa5f   :  { %2774 = vmatpush3.bf16.msra.mxu0 %v2773_v17 }
 0xa60   :  { %2775 = vmatprep.subr.bf16.mxu0 %v3091_v0 }
 0xa63   :  { %2777 = vmatpush3.bf16.msra.mxu0 %v2776_v21  ;;  %v1544_v21 = vld [vmem:[#allocation10 + $0x8] sm:$0xff] }
 0xa64   :  { %2778 = vmatprep.subr.bf16.mxu0 %v3091_v0  ;;  %v2812_v22 = vpack.c.bf16 %v1544_v21, %v1543_v20  ;;  %v1702_v20 = vld [vmem:[#allocation11 + $0x18] sm:$0xff] }
 0xa67   :  { %2780 = vmatpush3.bf16.msra.mxu0 %v2779_v25 }
 0xa68   :  { %2781 = vmatprep.subr.bf16.mxu0 %v3091_v0 }
 0xa6b   :  { %2783 = vmatpush3.bf16.msra.mxu0 %v2782_v29  ;;  %v1549_v29 = vld [vmem:[#allocation10 + $0x30] sm:$0xff] }
 0xa6c   :  { %2784 = vmatprep.subr.bf16.mxu0 %v3091_v0 }
 0xa6f   :  { %2786 = vmatpush3.bf16.msra.mxu0 %v2785_v38  ;;  %v1553_v38 = vld [vmem:[#allocation10 + $0x50] sm:$0xff] }
 0xa70   :  { %2811 = vmatprep.subr.bf16.mxu0 %v3091_v0  ;;  %v2827_v40 = vpack.c.bf16 %v1554_v39, %v1553_v38  ;;  %v1713_v38 = vld [vmem:[#allocation11 + $0x70] sm:$0xff]  ;;  %v1714_v39 = vld [vmem:[#allocation11 + $0x78] sm:$0xff] }
 0xb25   :  { %v1010_v9 = vpop.f32.mrb[6].mxu0 }
 0xb26   :  { %v2350_v51 = vpop.f32.mrb[7].mxu0  ;;  %2384 = vmatmul.mubr.f32.vlgmr.msra.gmra.mrb[10].mxu1 %v1010_v9 }
 0xb27   :  { %2387 = vmatpush3.msra.mxu1 %v1010_v9  ;;  %2388 = vmatprep.mubr.msk.f32.mxu1 %vm3092_vm0, %v3093_v1  ;;  %v2800_v9 = vpack.c.bf16 %v1856_v6, %v1855_v3  ;;  %v1857_v51 = vld [vmem:[%s3847_s8 + $0xd0] sm:$0xff]  ;;  %v2836_v3 = vpack.c.bf16 %v1528_v59, %v1527_v56  ;;  %v1866_v56 = vld [vmem:[%s3852_s13] ss:$0 sm:$0xff]  ;;  %s3051_s13 = scalar_lea.vmem %s1812_s7, 128 }
 0xb28   :  { %2787 = vmatprep.subr.bf16.mxu1 %v3091_v0  ;;  %p3052_p6 = scmp.ne.s32.totalorder %s1812_s7, %s3051_s13  ;;  %p3057_p8 = scmp.lt.s32.totalorder %s3051_s13, %s3051_s13 }
 0xb2a   :  { %p3058_p9 = por %p3057_p8, %p3056_p7 }
 0xb2c   :  { %p3059_p10 = pnand %p3058_p9, %p3052_p6 }
 0xbf9   :  { %v1080_v12 = vpop.f32.mrb[10].mxu1 }
 0xbfa   :  { %1118 = vperm.xlu0 %2896, %v1080_v12   ;;  %v2385_v52 = vpop.f32.mrb[11].mxu1 }
 0xc18   :  { %1084 = vxpose.xlu0.b32.start.end [1/1] (short) (narrow) %v1080_v12, 8  ;;  %v1858_v12 = vld [vmem:[%s3847_s8 + $0xd8] sm:$0xff] }
 0xc19   :  { %v2803_v52 = vpack.c.bf16 %v1858_v12, %v1857_v51  ;;  %v1530_v51 = vld [vmem:[#allocation8 + $0x18] sm:$0xff] }
 0xc79   :  { %v1119_v53 = vpop.permute.xlu0 %1118 }
 0xc98   :  { %v1100_v57 = vpop.trf.xlu0 }
 0xc99   :  { %v1124_v58 = vrot.slane %v1100_v57, %v3514_v28  ;;  %v1860_v57 = vld [vmem:[%s3847_s8 + $0xe8] sm:$0xff] }
 0xc9b   :  { %v1125_v60 = vadd.f32 %v1124_v58, %v1119_v53  ;;  %v1859_v53 = vld [vmem:[%s3847_s8 + $0xe0] sm:$0xff] }
 0xc9c   :  { %v2806_v58 = vpack.c.bf16 %v1860_v57, %v1859_v53  ;;  %v1532_v53 = vld [vmem:[#allocation8 + $0x28] sm:$0xff] }
 0xc9d   :  { %v1127_v61 = vmul.f32 0.2, %v1125_v60  ;;  %vm1126_vm4 = vcmp.gt.f32.partialorder %v1125_v60, 0.0 }
 0xc9f   :  { %v1128_v2 = vsel %vm1126_vm4, %v1125_v60, %v1127_v61  ;;  %v1861_v60 = vld [vmem:[%s3847_s8 + $0xf0] sm:$0xff]  ;;  %v1862_v61 = vld [vmem:[%s3847_s8 + $0xf8] sm:$0xff] }
 0xca0   :  { %v1129_v15 = vadd.f32 %v1128_v2, %v3708_v63  ;;  %v2809_v2 = vpack.c.bf16 %v1862_v61, %v1861_v60  ;;  %v1534_v60 = vld [vmem:[#allocation8 + $0x38] sm:$0xff] }
 0xca2   :  { %v1130_v18 = vsel %vm444_vm2, %v1129_v15, -inf }
 0xca3   :  { %1131 = vmax.xlane.f32.xlu1 %v1130_v18 }
 0xd30   :  { %v1132_v24 = vpop.xlane.xlu1 %1131 }
 0xd31   :  { %v1133_v30 = vsub.f32 %v1129_v15, %v1132_v24 }
 0xd33   :  { %v1134_v36 = vmul.f32 1.442695, %v1133_v30 }
 0xd35   :  { %2906 = vpow2.f32 %v1134_v36 }
 0xd3f   :  { %v2907_v4 = vpop.eup %2906 }
 0xd40   :  { %v1136_v42 = vsel %vm444_vm2, %v2907_v4, 0.0 }
 0xd41   :  { %1137 = vadd.xlane.f32.xlu1 %v1136_v42 }
 0xdce   :  { %v1138_v31 = vpop.xlane.xlu1 %1137 }
 0xdcf   :  { %2908 = vrcp.f32 %v1138_v31  ;;  %v1550_v31 = vld [vmem:[#allocation10 + $0x38] sm:$0xff] }
 0xdd9   :  { %v2909_v32 = vpop.eup %2908 }
 0xdda   :  { %v1140_v33 = vmul.f32 %v2909_v32, %v2907_v4  ;;  %v2821_v32 = vpack.c.bf16 %v1550_v31, %v1549_v29  ;;  %v1710_v31 = vld [vmem:[#allocation11 + $0x58] sm:$0xff] }
 0xddc   :  { %2389 = vmatmul.mubr.msk.f32.vlgmr.msra.gmra.mrb[12].mxu1 %vm444_vm2, %v1140_v33  ;;  %v1551_v33 = vld [vmem:[#allocation10 + $0x40] sm:$0xff] }
 0xddd   :  { %2458 = vmatprep.mubr.msk.f32.mxu1 %vm3092_vm0, %v3093_v1  ;;  %2789 = vmatpush3.bf16.msra.mxu1 %v2788_v43  ;;  %v2824_v37 = vpack.c.bf16 %v1552_v35, %v1551_v33  ;;  %v1556_v43 = vld [vmem:[#allocation10 + $0x68] sm:$0xff]  ;;  %v1711_v33 = vld [vmem:[#allocation11 + $0x60] sm:$0xff] }
 0xdde   :  { %2790 = vmatprep.subr.bf16.mxu1 %v3091_v0  ;;  %v2830_v44 = vpack.c.bf16 %v1556_v43, %v1555_v41  ;;  %v1712_v35 = vld [vmem:[#allocation11 + $0x68] sm:$0xff] }
 0xde1   :  { %2792 = vmatpush3.bf16.msra.mxu1 %v2791_v45  ;;  %v1557_v45 = vld [vmem:[#allocation10 + $0x70] sm:$0xff] }
 0xde2   :  { %2793 = vmatprep.subr.bf16.mxu1 %v3091_v0  ;;  %v2833_v48 = vpack.c.bf16 %v1558_v47, %v1557_v45 }
 0xde5   :  { %2795 = vmatpush3.bf16.msra.mxu1 %v2794_v49 }
 0xde6   :  { %2796 = vmatprep.subr.bf16.mxu1 %v3091_v0 }
 0xde9   :  { %2798 = vmatpush3.bf16.msra.mxu1 %v2797_v62 }
 0xdea   :  { %2799 = vmatprep.subr.bf16.mxu1 %v3091_v0 }
 0xded   :  { %2801 = vmatpush3.bf16.msra.mxu1 %v2800_v9  ;;  %v1529_v9 = vld [vmem:[#allocation8 + $0x10] sm:$0xff] }
 0xdee   :  { %2802 = vmatprep.subr.bf16.mxu1 %v3091_v0  ;;  %v2839_v12 = vpack.c.bf16 %v1530_v51, %v1529_v9 }
 0xdf1   :  { %2804 = vmatpush3.bf16.msra.mxu1 %v2803_v52  ;;  %v1531_v52 = vld [vmem:[#allocation8 + $0x20] sm:$0xff] }
 0xdf2   :  { %2805 = vmatprep.subr.bf16.mxu1 %v3091_v0  ;;  %v2842_v57 = vpack.c.bf16 %v1532_v53, %v1531_v52 }
 0xdf5   :  { %2807 = vmatpush3.bf16.msra.mxu1 %v2806_v58  ;;  %v1533_v58 = vld [vmem:[#allocation8 + $0x30] sm:$0xff] }
 0xdf6   :  { %2808 = vmatprep.subr.bf16.mxu1 %v3091_v0  ;;  %v2845_v61 = vpack.c.bf16 %v1534_v60, %v1533_v58 }
 0xdf9   :  { %2810 = vmatpush3.bf16.msra.mxu1 %v2809_v2  ;;  %v1535_v2 = vld [vmem:[#allocation8 + $0x40] sm:$0xff] }
 0xdfa   :  { %2461 = vmatprep.subr.mxu1 %v3093_v1 }
 0xeaf   :  { %v1210_v15 = vpop.f32.mrb[12].mxu1 }
 0xeb0   :  { %v1211_v18 = vadd.f32 %v3592_v55, %v1210_v15  ;;  %v2390_v24 = vpop.f32.mrb[13].mxu1  ;;  %v1536_v15 = vld [vmem:[#allocation8 + $0x48] sm:$0xff] }
 0xeb1   :  { %v1537_v24 = vld [vmem:[#allocation8 + $0x50] sm:$0xff] }
 0xeb2   :  { %v1214_v30 = vmax.f32 %v1211_v18, 0.0  ;;  %v2848_v18 = vpack.c.bf16 %v1536_v15, %v1535_v2 }
 0xeb4   :  { %2424 = vmatmul.mubr.f32.vlgmr.msra.gmra.mrb[8].mxu0 %v1214_v30  ;;  %v1538_v30 = vld [vmem:[#allocation8 + $0x58] sm:$0xff] }
 0xeb5   :  { %2498 = vmatprep.mubr.msk.f32.mxu0 %vm3092_vm0, %v3093_v1  ;;  %2813 = vmatpush3.bf16.msra.mxu0 %v2812_v22 }
 0xeb6   :  { %2814 = vmatprep.subr.bf16.mxu0 %v3091_v0 }
 0xf87   :  { %v1317_v36 = vpop.f32.mrb[8].mxu0 }
 0xf88   :  { %v2425_v4 = vpop.f32.mrb[9].mxu0  ;;  %2459 = vmatmul.mubr.f32.vlgmr.msra.gmra.mrb[14].mxu1 %v1317_v36 }
 0xf89   :  { %2462 = vmatpush3.msra.mxu1 %v1317_v36  ;;  %2463 = vmatprep.mubr.msk.f32.mxu1 %vm3092_vm0, %v3093_v1  ;;  %v2851_v36 = vpack.c.bf16 %v1538_v30, %v1537_v24  ;;  %v1539_v4 = vld [vmem:[#allocation8 + $0x60] sm:$0xff] }
 0xf8a   :  { %2835 = vmatprep.subr.bf16.mxu1 %v3091_v0 }
0x105b   :  { %v1387_v42 = vpop.f32.mrb[14].mxu1 }
0x105c   :  { %1425 = vperm.xlu1 %2897, %v1387_v42   ;;  %v2460_v5 = vpop.f32.mrb[15].mxu1 }
0x1085   :  { %1391 = vxpose.xlu1.b32.start.end [1/1] (short) (narrow) %v1387_v42, 8  ;;  %v1540_v42 = vld [vmem:[#allocation8 + $0x68] sm:$0xff] }
0x1086   :  { %v2854_v5 = vpack.c.bf16 %v1540_v42, %v1539_v4 }
0x10db   :  { %v1426_v55 = vpop.permute.xlu1 %1425 }
0x1105   :  { %v1407_v46 = vpop.trf.xlu1 }
0x1106   :  { %v1431_v7 = vrot.slane %v1407_v46, %v3514_v28  ;;  %v1545_v28 = vld [vmem:[#allocation10 + $0x10] sm:$0xff]  ;;  %v1542_v46 = vld [vmem:[#allocation8 + $0x78] sm:$0xff] }
0x1107   :  { %v2815_v25 = vpack.c.bf16 %v1546_v23, %v1545_v28  ;;  %v1704_v28 = vld [vmem:[#allocation11 + $0x28] sm:$0xff]  ;;  %v1705_v23 = vld [vmem:[#allocation11 + $0x30] sm:$0xff] }
0x1108   :  { %v1432_v50 = vadd.f32 %v1431_v7, %v1426_v55  ;;  %v1541_v55 = vld [vmem:[#allocation8 + $0x70] sm:$0xff] }
0x1109   :  { %2816 = vmatpush3.bf16.msra.mxu0 %v2815_v25  ;;  %v2857_v7 = vpack.c.bf16 %v1542_v46, %v1541_v55  ;;  %v1706_v25 = vld [vmem:[#allocation11 + $0x38] sm:$0xff] }
0x110a   :  { %v1434_v8 = vmul.f32 0.2, %v1432_v50  ;;  %vm1433_vm5 = vcmp.gt.f32.partialorder %v1432_v50, 0.0  ;;  %2817 = vmatprep.subr.bf16.mxu0 %v3091_v0 }
0x110c   :  { %v1435_v10 = vsel %vm1433_vm5, %v1432_v50, %v1434_v8  ;;  %v1826_v50 = vld [vmem:[%s3848_s9] ss:$0 sm:$0xff] }
0x110d   :  { %v1436_v11 = vadd.f32 %v1435_v10, %v3708_v63  ;;  %v1547_v63 = vld [vmem:[#allocation10 + $0x20] sm:$0xff]  ;;  %v842_v8 = vadd.f32 %v1826_v50, %v3697_v54 }
0x110e   :  { %v2818_v27 = vpack.c.bf16 %v1548_v26, %v1547_v63  ;;  %v1699_v10 = vld [vmem:[#allocation11] sm:$0xff]  ;;  %v2869_v63 = vpack.c.bf16 %v1706_v25, %v1705_v23 }
0x110f   :  { %v1437_v13 = vsel %vm444_vm2, %v1436_v11, -inf  ;;  %v1703_v54 = vld [vmem:[#allocation11 + $0x20] sm:$0xff] }
0x1110   :  { %1438 = vmax.xlane.f32.xlu0 %v1437_v13  ;;  %2819 = vmatpush3.bf16.msra.mxu0 %v2818_v27  ;;  %v1864_v13 = vld [vmem:[%s3848_s9 + $0x1] ss:$0 sm:$0xff]  ;;  %v2866_v22 = vpack.c.bf16 %v1704_v28, %v1703_v54  ;;  %v1708_v27 = vld [vmem:[#allocation11 + $0x48] sm:$0xff] }
0x1111   :  { %2820 = vmatprep.subr.bf16.mxu0 %v3091_v0  ;;  %v1707_v26 = vld [vmem:[#allocation11 + $0x40] sm:$0xff] }
0x1112   :  { %v2872_v29 = vpack.c.bf16 %v1708_v27, %v1707_v26 }
0x1114   :  { %2822 = vmatpush3.bf16.msra.mxu0 %v2821_v32 }
0x1115   :  { %2823 = vmatprep.subr.bf16.mxu0 %v3091_v0 }
0x1118   :  { %2825 = vmatpush3.bf16.msra.mxu0 %v2824_v37  ;;  %v2878_v37 = vpack.c.bf16 %v1712_v35, %v1711_v33 }
0x1119   :  { %2826 = vmatprep.subr.bf16.mxu0 %v3091_v0 }
0x111c   :  { %2828 = vmatpush3.bf16.msra.mxu0 %v2827_v40  ;;  %v2881_v40 = vpack.c.bf16 %v1714_v39, %v1713_v38 }
0x111d   :  { %2829 = vmatprep.subr.bf16.mxu0 %v3091_v0 }
0x1120   :  { %2831 = vmatpush3.bf16.msra.mxu0 %v2830_v44  ;;  %v2918_v44 = vld [vmem:[#allocation2] sm:$0xff] }
0x1121   :  { %2832 = vmatprep.subr.bf16.mxu0 %v3091_v0 }
0x1124   :  { %2834 = vmatpush3.bf16.msra.mxu0 %v2833_v48 }
0x1125   :  { %2859 = vmatprep.subr.bf16.mxu0 %v3091_v0 }
0x119d   :  { %v1439_v14 = vpop.xlane.xlu0 %1438 }
0x119e   :  { %v1440_v16 = vsub.f32 %v1436_v11, %v1439_v14  ;;  %v1700_v11 = vld [vmem:[#allocation11 + $0x8] sm:$0xff] }
0x11a0   :  { %v1441_v34 = vmul.f32 1.442695, %v1440_v16  ;;  %v2860_v16 = vpack.c.bf16 %v1700_v11, %v1699_v10 }
0x11a2   :  { %2910 = vpow2.f32 %v1441_v34 }
0x11ac   :  { %v2911_v17 = vpop.eup %2910 }
0x11ad   :  { %v1443_v19 = vsel %vm444_vm2, %v2911_v17, 0.0 }
0x11ae   :  { %1444 = vadd.xlane.f32.xlu1 %v1443_v19  ;;  %v1701_v19 = vld [vmem:[#allocation11 + $0x10] sm:$0xff] }
0x11af   :  { %v2863_v21 = vpack.c.bf16 %v1702_v20, %v1701_v19 }
0x123b   :  { %v1445_v49 = vpop.xlane.xlu1 %1444 }
0x123c   :  { %2912 = vrcp.f32 %v1445_v49 }
0x1246   :  { %v2913_v62 = vpop.eup %2912 }
0x1247   :  { %v1447_v6 = vmul.f32 %v2913_v62, %v2911_v17 }
0x1249   :  { %2464 = vmatmul.mubr.msk.f32.vlgmr.msra.gmra.mrb[16].mxu1 %vm444_vm2, %v1447_v6 }
0x124a   :  { %2837 = vmatpush3.bf16.msra.mxu1 %v2836_v3  ;;  %2533 = vmatprep.mubr.msk.f32.mxu1 %vm3092_vm0, %v3093_v1 }
0x124b   :  { %2838 = vmatprep.subr.bf16.mxu1 %v3091_v0 }
0x124e   :  { %2840 = vmatpush3.bf16.msra.mxu1 %v2839_v12 }
0x124f   :  { %2841 = vmatprep.subr.bf16.mxu1 %v3091_v0 }
0x1252   :  { %2843 = vmatpush3.bf16.msra.mxu1 %v2842_v57 }
0x1253   :  { %2844 = vmatprep.subr.bf16.mxu1 %v3091_v0 }
0x1256   :  { %2846 = vmatpush3.bf16.msra.mxu1 %v2845_v61 }
0x1257   :  { %2847 = vmatprep.subr.bf16.mxu1 %v3091_v0 }
0x125a   :  { %2849 = vmatpush3.bf16.msra.mxu1 %v2848_v18 }
0x125b   :  { %2850 = vmatprep.subr.bf16.mxu1 %v3091_v0 }
0x125e   :  { %2852 = vmatpush3.bf16.msra.mxu1 %v2851_v36 }
0x125f   :  { %2853 = vmatprep.subr.bf16.mxu1 %v3091_v0 }
0x1262   :  { %2855 = vmatpush3.bf16.msra.mxu1 %v2854_v5 }
0x1263   :  { %2856 = vmatprep.subr.bf16.mxu1 %v3091_v0 }
0x1266   :  { %2858 = vmatpush3.bf16.msra.mxu1 %v2857_v7 }
0x1269   :  { %2534 = vmatmul.mubr.f32.vlgmr.msra.gmra.mrb[18].mxu1 %v842_v8 }
0x131c   :  { %v1523_v14 = vpop.f32.mrb[16].mxu1 }
0x131d   :  { %v1524_v34 = vadd.f32 %v1864_v13, %v1523_v14  ;;  %v2465_v17 = vpop.f32.mrb[17].mxu1 }
0x131f   :  { %2499 = vmatmul.mubr.f32.vlgmr.msra.gmra.mrb[10].mxu0 %v1524_v34 }
0x1320   :  { %2861 = vmatpush3.bf16.msra.mxu0 %v2860_v16  ;;  %2568 = vmatprep.mubr.msk.f32.mxu0 %vm3092_vm0, %v3093_v1  ;;  %v1709_v1 = vld [vmem:[#allocation11 + $0x50] sm:$0xff] }
0x1321   :  { %2862 = vmatprep.subr.bf16.mxu0 %v3091_v0  ;;  %v2875_v32 = vpack.c.bf16 %v1710_v31, %v1709_v1 }
0x1324   :  { %2864 = vmatpush3.bf16.msra.mxu0 %v2863_v21 }
0x1325   :  { %2865 = vmatprep.subr.bf16.mxu0 %v3091_v0 }
0x1328   :  { %2867 = vmatpush3.bf16.msra.mxu0 %v2866_v22 }
0x1329   :  { %2868 = vmatprep.subr.bf16.mxu0 %v3091_v0 }
0x132c   :  { %2870 = vmatpush3.bf16.msra.mxu0 %v2869_v63 }
0x132d   :  { %2871 = vmatprep.subr.bf16.mxu0 %v3091_v0 }
0x1330   :  { %2873 = vmatpush3.bf16.msra.mxu0 %v2872_v29 }
0x1331   :  { %2874 = vmatprep.subr.bf16.mxu0 %v3091_v0 }
0x1334   :  { %2876 = vmatpush3.bf16.msra.mxu0 %v2875_v32 }
0x1335   :  { %2877 = vmatprep.subr.bf16.mxu0 %v3091_v0 }
0x1338   :  { %2879 = vmatpush3.bf16.msra.mxu0 %v2878_v37 }
0x1339   :  { %2880 = vmatprep.subr.bf16.mxu0 %v3091_v0 }
0x133c   :  { %v1695_v41 = vpop.f32.mrb[18].mxu1  ;;  %2882 = vmatpush3.bf16.msra.mxu0 %v2881_v40 }
0x133d   :  { %v2535_v43 = vpop.f32.mrb[19].mxu1 }
0x133f   :  { %2569 = vmatmul.mubr.f32.vlgmr.msra.gmra.mrb[12].mxu0 %v2918_v44 }
0x13f2   :  { %v1625_v45 = vpop.f32.mrb[10].mxu0 }
0x13f3   :  { %v1696_v47 = vadd.f32 %v1695_v41, %v1625_v45  ;;  %v2500_v48 = vpop.f32.mrb[11].mxu0 }
0x1412   :  { %v1781_v49 = vpop.f32.mrb[12].mxu0 }
0x1413   :  { %v1785_v59 = vadd.f32 %v1781_v49, %v1696_v47  ;;  %v2570_v62 = vpop.f32.mrb[13].mxu0 }
0x1415   :  { %v1793_v3 = vadd.f32 %v1866_v56, %v1785_v59 }
0x1417   :  { %1794 = vmax.xlane.f32.xlu0 %v1793_v3 }
0x14a4   :  { %v1795_v6 = vpop.xlane.xlu0 %1794 }
0x14a5   :  { %v1796_v9 = vsub.f32 %v1793_v3, %v1795_v6 }
0x14a7   :  { %v1797_v0 = vmul.f32 1.442695, %v1796_v9 }
0x14a9   :  { %2914 = vpow2.f32 %v1797_v0 }
0x14b3   :  { %v2915_v51 = vpop.eup %2914 }
0x14b4   :  { %1799 = vadd.xlane.f32.xlu0 %v2915_v51 }
0x1541   :  { %v1800_v12 = vpop.xlane.xlu0 %1799 }
0x1542   :  { %2916 = vlog2.f32 %v1800_v12 }
0x154c   :  { %v2917_v52 = vpop.eup %2916 }
0x154d   :  { %v1802_v53 = vmul.f32 0.6931472, %v2917_v52 }
0x154f   :  { %v1803_v57 = vsub.f32 %v1796_v9, %v1802_v53 }
0x1551   :  { %1804 = vst [vmem:[#allocation13] sm:$0xff] %v1803_v57 }
0x1552   :  { %3062 = shalt.err (!%p3059_p10)
}
0x1553   :  { %s3063_s17 = scalar_lea.hbm %s3853_s14, 128 }
0x1554   :  { %p3064_p11 = scmp.ne.s32.totalorder %s3853_s14, %s3063_s17  ;;  %p3067_p12 = scmp.lt.u32.totalorder %s3063_s17, %s3853_s14 }
0x1556   :  { %p3069_p13 = pnand %p3067_p12, %p3064_p11 }
0x1558   :  { %3072 = shalt.err (!%p3069_p13)
}
0x1559   :  { %1814 = dma.vmem_to_hbm [thread:$0]  %s1812_s7, 128, %s3853_s14, [#allocation4]  }
0x155a   :  { %3081 = dma.done.wait [#allocation4], 128  }
0x155b   :  { %3082 = vsyncadd [#allocation4], 4294967168 }
0x155c   :  { %1818 = vsyncpa [#allocation3], 1 }
0x155d   :  { %1819 = vsyncpa [#allocation6], 1 }
0x155e   :  { %1820 = vsyncpa [#allocation9], 1 }
0x155f   :  { %1821 = vsyncpa [#allocation12], 1 }
0x1560   :  { %1822 = vsyncpa [#allocation4], 1 }

</bundles_post_ra>
